<compile_context>
chip_gen: v7x
topology: tpu7x:2x2x1
jax: 0.10.0
libtpu: 0.0.40
codegen_flags: <defaults>
</compile_context>

<pallas_src>
import functools

import jax
import jax.numpy as jnp
from jax.experimental import pallas as pl
from jax.experimental.pallas import tpu as pltpu

# Layer sizes matching the PyTorch module.
LAYER_DIMS = [784, 512, 256, 128, 64, 32, 24, 24, 24, 24, 10]


def _round_up(x, m):
    return (x + m - 1) // m * m


def mlp_softmax_kernel(x_ref, *refs):
    """One batch tile of the whole MLP: 10 matmuls + ReLUs + stable softmax.

    refs = (w0, b0, w1, b1, ..., w9, b9, out)
    Weights arrive as bf16 (MXU-native); biases and all elementwise work stay f32.
    """
    out_ref = refs[-1]
    wb_refs = refs[:-1]
    n_layers = len(wb_refs) // 2

    h = x_ref[...]                                   # (TB, 784) f32
    for i in range(n_layers):
        w = wb_refs[2 * i][...]                      # (in, out) bf16
        b = wb_refs[2 * i + 1][...]                  # (1, out)  f32, broadcasts over batch
        h = jnp.dot(h.astype(jnp.bfloat16), w,
                    preferred_element_type=jnp.float32) + b
        if i < n_layers - 1:
            h = jnp.maximum(h, 0.0)                  # ReLU on hidden layers (f32)

    # Numerically stable softmax over features (== PyTorch Softmax(dim=1) on 2-D input).
    m = jnp.max(h, axis=-1, keepdims=True)
    e = jnp.exp(h - m)
    denom = jnp.sum(e, axis=-1, keepdims=True)
    r = pl.reciprocal(denom, approx=True)            # EUP vrcp (free slot)
    r = r * (2.0 - denom * r)                        # one Newton step -> ~f32 accuracy
    out_ref[...] = e * r


@functools.partial(jax.jit, static_argnames=("block_b",))
def net_v4_forward(x, weights, biases, *, block_b=256):
    """x: (B, 784) float32. weights[i]: (in_i, out_i) f32. biases[i]: (1, out_i) f32."""
    batch = x.shape[0]
    d_in0 = LAYER_DIMS[0]
    n_classes = LAYER_DIMS[-1]

    # Batch tile: MXU-friendly, sublane-aligned, and never larger than needed.
    tb = min(block_b, _round_up(max(batch, 1), 8))
    padded_b = _round_up(batch, tb)
    if padded_b != batch:
        x = jnp.pad(x, ((0, padded_b - batch), (0, 0)))  # zero rows are softmax-safe

    # bf16 weights (halves resident VMEM + HBM traffic, native MXU format); f32 biases.
    w_bf16 = tuple(w.astype(jnp.bfloat16) for w in weights)
    b_f32 = tuple(b.astype(jnp.float32).reshape(1, -1) for b in biases)

    flat_params = []
    param_specs = []
    for w, b in zip(w_bf16, b_f32):
        flat_params += [w, b]
        # Constant block index across the batch grid => kept VMEM-resident, no re-DMA.
        param_specs += [
            pl.BlockSpec(w.shape, lambda i: (0, 0)),
            pl.BlockSpec(b.shape, lambda i: (0, 0)),
        ]

    grid = (padded_b // tb,)
    in_specs = [pl.BlockSpec((tb, d_in0), lambda i: (i, 0))] + param_specs
    out_specs = pl.BlockSpec((tb, n_classes), lambda i: (i, 0))

    # Advisory cost estimate for XLA scheduling around the custom call.
    flops = 2 * padded_b * sum(
        LAYER_DIMS[k] * LAYER_DIMS[k + 1] for k in range(len(LAYER_DIMS) - 1))
    param_bytes = sum(w.size * 2 for w in w_bf16) + sum(b.size * 4 for b in b_f32)
    bytes_accessed = padded_b * d_in0 * 4 + param_bytes + padded_b * n_classes * 4
    transcendentals = padded_b * n_classes           # softmax exp

    # Explicit VMEM budget: 2x (double-buffered) x/out tiles + params (2x slack) +
    # peak activations, rounded up with headroom. Fits v5e/v6e/v7x scoped limits.
    x_tile_bytes = tb * d_in0 * 4
    out_tile_bytes = tb * n_classes * 4
    act_peak_bytes = tb * max(LAYER_DIMS[1:]) * 4
    vmem_limit = max(
        2 * (x_tile_bytes + out_tile_bytes) + 2 * param_bytes + 4 * act_peak_bytes
        + (4 << 20),
        16 * 1024 * 1024,
    )

    out = pl.pallas_call(
        mlp_softmax_kernel,
        out_shape=jax.ShapeDtypeStruct((padded_b, n_classes), jnp.float32),
        grid=grid,
        in_specs=in_specs,
        out_specs=out_specs,
        compiler_params=pltpu.CompilerParams(
            dimension_semantics=("parallel",),       # 2-TC sharding on v7x
            vmem_limit_bytes=int(vmem_limit),
        ),
        cost_estimate=pl.CostEstimate(
            flops=int(flops),
            transcendentals=int(transcendentals),
            bytes_accessed=int(bytes_accessed),
        ),
    )(x, *flat_params)

    return out[:batch]


def init_params(key):
    """Deterministic synthetic parameters with PyTorch-Linear-like init/shapes."""
    weights, biases = [], []
    for i in range(len(LAYER_DIMS) - 1):
        d_in, d_out = LAYER_DIMS[i], LAYER_DIMS[i + 1]
        key, kw, kb = jax.random.split(key, 3)
        scale = 1.0 / jnp.sqrt(jnp.float32(d_in))
        # Stored as (in, out); equivalent to PyTorch's (out, in) weight transposed.
        w = jax.random.uniform(kw, (d_in, d_out), jnp.float32, -scale, scale)
        b = jax.random.uniform(kb, (1, d_out), jnp.float32, -scale, scale)
        weights.append(w)
        biases.append(b)
    return weights, biases


def reference_forward(x, weights, biases, *, mixed=True):
    """Pure-JAX reference. mixed=True mimics the kernel's bf16-matmul/f32-accumulate path."""
    h = x.astype(jnp.float32)
    for i, (w, b) in enumerate(zip(weights, biases)):
        if mixed:
            h = jnp.dot(h.astype(jnp.bfloat16), w.astype(jnp.bfloat16),
                        preferred_element_type=jnp.float32) + b
        else:
            h = jnp.dot(h, w) + b
        if i < len(weights) - 1:
            h = jnp.maximum(h, 0.0)
    return jax.nn.softmax(h, axis=1)


if __name__ == "__main__":
    key = jax.random.PRNGKey(0)
    key, kx = jax.random.split(key)
    weights, biases = init_params(key)

    # Small-shape check (single grid step).
    batch = 8
    x = jax.random.normal(kx, (batch, LAYER_DIMS[0]), jnp.float32)
    out = jax.block_until_ready(net_v4_forward(x, tuple(weights), tuple(biases)))
    assert out.shape == (batch, LAYER_DIMS[-1])
    assert jnp.allclose(jnp.sum(out, axis=1), jnp.ones((batch,)), atol=1e-4)
    ref_mixed = reference_forward(x, weights, biases, mixed=True)
    ref_f32 = reference_forward(x, weights, biases, mixed=False)
    assert jnp.allclose(out, ref_mixed, atol=2e-4, rtol=2e-3)
    assert jnp.allclose(out, ref_f32, atol=5e-2, rtol=5e-2)

    # Multi-step grid + ragged batch (exercises the 256-row tiling and zero-padding path).
    key, kx2 = jax.random.split(key)
    batch2 = 272  # not a multiple of the 256-row tile
    x2 = jax.random.normal(kx2, (batch2, LAYER_DIMS[0]), jnp.float32)
    out2 = jax.block_until_ready(net_v4_forward(x2, tuple(weights), tuple(biases)))
    ref2 = reference_forward(x2, weights, biases, mixed=True)
    assert out2.shape == (batch2, LAYER_DIMS[-1])
    assert jnp.allclose(out2, ref2, atol=2e-4, rtol=2e-3)
    assert jnp.allclose(jnp.sum(out2, axis=1), jnp.ones((batch2,)), atol=1e-4)

    print("KERNEL_OK")
</pallas_src>

<mosaic_0001>
module attributes {stable_mosaic.version = 11 : i64} {
  func.func @mlp_softmax_kernel(%arg0: i32, %arg1: memref<8x784xf32, #tpu.memory_space<vmem>>, %arg2: memref<784x512xbf16, #tpu.memory_space<vmem>>, %arg3: memref<1x512xf32, #tpu.memory_space<vmem>>, %arg4: memref<512x256xbf16, #tpu.memory_space<vmem>>, %arg5: memref<1x256xf32, #tpu.memory_space<vmem>>, %arg6: memref<256x128xbf16, #tpu.memory_space<vmem>>, %arg7: memref<1x128xf32, #tpu.memory_space<vmem>>, %arg8: memref<128x64xbf16, #tpu.memory_space<vmem>>, %arg9: memref<1x64xf32, #tpu.memory_space<vmem>>, %arg10: memref<64x32xbf16, #tpu.memory_space<vmem>>, %arg11: memref<1x32xf32, #tpu.memory_space<vmem>>, %arg12: memref<32x24xbf16, #tpu.memory_space<vmem>>, %arg13: memref<1x24xf32, #tpu.memory_space<vmem>>, %arg14: memref<24x24xbf16, #tpu.memory_space<vmem>>, %arg15: memref<1x24xf32, #tpu.memory_space<vmem>>, %arg16: memref<24x24xbf16, #tpu.memory_space<vmem>>, %arg17: memref<1x24xf32, #tpu.memory_space<vmem>>, %arg18: memref<24x24xbf16, #tpu.memory_space<vmem>>, %arg19: memref<1x24xf32, #tpu.memory_space<vmem>>, %arg20: memref<24x10xbf16, #tpu.memory_space<vmem>>, %arg21: memref<1x10xf32, #tpu.memory_space<vmem>>, %arg22: memref<8x10xf32, #tpu.memory_space<vmem>>) attributes {dimension_semantics = [#tpu.dimension_semantics<parallel>], iteration_bounds = array<i64: 1>, scalar_prefetch = 0 : i64, scratch_operands = 0 : i64, tpu.core_type = #tpu.core_type<tc>, window_params = [{transform_indices = @transform_0, window_bounds = array<i64: 8, 784>}, {pipeline_mode = #tpu.pipeline_mode<synchronous>, transform_indices = @transform_1, window_bounds = array<i64: 784, 512>}, {pipeline_mode = #tpu.pipeline_mode<synchronous>, transform_indices = @transform_2, window_bounds = array<i64: 1, 512>}, {pipeline_mode = #tpu.pipeline_mode<synchronous>, transform_indices = @transform_3, window_bounds = array<i64: 512, 256>}, {pipeline_mode = #tpu.pipeline_mode<synchronous>, transform_indices = @transform_4, window_bounds = array<i64: 1, 256>}, {pipeline_mode = #tpu.pipeline_mode<synchronous>, transform_indices = @transform_5, window_bounds = array<i64: 256, 128>}, {pipeline_mode = #tpu.pipeline_mode<synchronous>, transform_indices = @transform_6, window_bounds = array<i64: 1, 128>}, {pipeline_mode = #tpu.pipeline_mode<synchronous>, transform_indices = @transform_7, window_bounds = array<i64: 128, 64>}, {pipeline_mode = #tpu.pipeline_mode<synchronous>, transform_indices = @transform_8, window_bounds = array<i64: 1, 64>}, {pipeline_mode = #tpu.pipeline_mode<synchronous>, transform_indices = @transform_9, window_bounds = array<i64: 64, 32>}, {pipeline_mode = #tpu.pipeline_mode<synchronous>, transform_indices = @transform_10, window_bounds = array<i64: 1, 32>}, {pipeline_mode = #tpu.pipeline_mode<synchronous>, transform_indices = @transform_11, window_bounds = array<i64: 32, 24>}, {pipeline_mode = #tpu.pipeline_mode<synchronous>, transform_indices = @transform_12, window_bounds = array<i64: 1, 24>}, {pipeline_mode = #tpu.pipeline_mode<synchronous>, transform_indices = @transform_13, window_bounds = array<i64: 24, 24>}, {pipeline_mode = #tpu.pipeline_mode<synchronous>, transform_indices = @transform_14, window_bounds = array<i64: 1, 24>}, {pipeline_mode = #tpu.pipeline_mode<synchronous>, transform_indices = @transform_15, window_bounds = array<i64: 24, 24>}, {pipeline_mode = #tpu.pipeline_mode<synchronous>, transform_indices = @transform_16, window_bounds = array<i64: 1, 24>}, {pipeline_mode = #tpu.pipeline_mode<synchronous>, transform_indices = @transform_17, window_bounds = array<i64: 24, 24>}, {pipeline_mode = #tpu.pipeline_mode<synchronous>, transform_indices = @transform_18, window_bounds = array<i64: 1, 24>}, {pipeline_mode = #tpu.pipeline_mode<synchronous>, transform_indices = @transform_19, window_bounds = array<i64: 24, 10>}, {pipeline_mode = #tpu.pipeline_mode<synchronous>, transform_indices = @transform_20, window_bounds = array<i64: 1, 10>}, {transform_indices = @transform_21, window_bounds = array<i64: 8, 10>}]} {
    %c0 = arith.constant 0 : index
    %c0_0 = arith.constant 0 : index
    %0 = vector.load %arg1[%c0, %c0_0] : memref<8x784xf32, #tpu.memory_space<vmem>>, vector<8x784xf32>
    %c0_1 = arith.constant 0 : index
    %c0_2 = arith.constant 0 : index
    %1 = vector.load %arg2[%c0_1, %c0_2] : memref<784x512xbf16, #tpu.memory_space<vmem>>, vector<784x512xbf16>
    %c0_3 = arith.constant 0 : index
    %c0_4 = arith.constant 0 : index
    %2 = vector.load %arg3[%c0_3, %c0_4] : memref<1x512xf32, #tpu.memory_space<vmem>>, vector<1x512xf32>
    %3 = arith.truncf %0 : vector<8x784xf32> to vector<8x784xbf16>
    %cst = arith.constant dense<0.000000e+00> : vector<8x512xf32>
    %4 = tpu.matmul %3, %1, %cst {dimension_numbers = #tpu.dot_dimension_numbers<[1], [0], [0], [1], [0, 0, 1, 1], [], []>} : vector<8x784xbf16>, vector<784x512xbf16>, vector<8x512xf32> -> vector<8x512xf32>
    %5 = vector.broadcast %2 : vector<1x512xf32> to vector<8x512xf32>
    %6 = arith.addf %4, %5 : vector<8x512xf32>
    %cst_5 = arith.constant 0.000000e+00 : f32
    %7 = vector.broadcast %cst_5 : f32 to vector<8x512xf32>
    %8 = arith.maximumf %6, %7 : vector<8x512xf32>
    %c0_6 = arith.constant 0 : index
    %c0_7 = arith.constant 0 : index
    %9 = vector.load %arg4[%c0_6, %c0_7] : memref<512x256xbf16, #tpu.memory_space<vmem>>, vector<512x256xbf16>
    %c0_8 = arith.constant 0 : index
    %c0_9 = arith.constant 0 : index
    %10 = vector.load %arg5[%c0_8, %c0_9] : memref<1x256xf32, #tpu.memory_space<vmem>>, vector<1x256xf32>
    %11 = arith.truncf %8 : vector<8x512xf32> to vector<8x512xbf16>
    %cst_10 = arith.constant dense<0.000000e+00> : vector<8x256xf32>
    %12 = tpu.matmul %11, %9, %cst_10 {dimension_numbers = #tpu.dot_dimension_numbers<[1], [0], [0], [1], [0, 0, 1, 1], [], []>} : vector<8x512xbf16>, vector<512x256xbf16>, vector<8x256xf32> -> vector<8x256xf32>
    %13 = vector.broadcast %10 : vector<1x256xf32> to vector<8x256xf32>
    %14 = arith.addf %12, %13 : vector<8x256xf32>
    %cst_11 = arith.constant 0.000000e+00 : f32
    %15 = vector.broadcast %cst_11 : f32 to vector<8x256xf32>
    %16 = arith.maximumf %14, %15 : vector<8x256xf32>
    %c0_12 = arith.constant 0 : index
    %c0_13 = arith.constant 0 : index
    %17 = vector.load %arg6[%c0_12, %c0_13] : memref<256x128xbf16, #tpu.memory_space<vmem>>, vector<256x128xbf16>
    %c0_14 = arith.constant 0 : index
    %c0_15 = arith.constant 0 : index
    %18 = vector.load %arg7[%c0_14, %c0_15] : memref<1x128xf32, #tpu.memory_space<vmem>>, vector<1x128xf32>
    %19 = arith.truncf %16 : vector<8x256xf32> to vector<8x256xbf16>
    %cst_16 = arith.constant dense<0.000000e+00> : vector<8x128xf32>
    %20 = tpu.matmul %19, %17, %cst_16 {dimension_numbers = #tpu.dot_dimension_numbers<[1], [0], [0], [1], [0, 0, 1, 1], [], []>} : vector<8x256xbf16>, vector<256x128xbf16>, vector<8x128xf32> -> vector<8x128xf32>
    %21 = vector.broadcast %18 : vector<1x128xf32> to vector<8x128xf32>
    %22 = arith.addf %20, %21 : vector<8x128xf32>
    %cst_17 = arith.constant 0.000000e+00 : f32
    %23 = vector.broadcast %cst_17 : f32 to vector<8x128xf32>
    %24 = arith.maximumf %22, %23 : vector<8x128xf32>
    %c0_18 = arith.constant 0 : index
    %c0_19 = arith.constant 0 : index
    %25 = vector.load %arg8[%c0_18, %c0_19] : memref<128x64xbf16, #tpu.memory_space<vmem>>, vector<128x64xbf16>
    %c0_20 = arith.constant 0 : index
    %c0_21 = arith.constant 0 : index
    %26 = vector.load %arg9[%c0_20, %c0_21] : memref<1x64xf32, #tpu.memory_space<vmem>>, vector<1x64xf32>
    %27 = arith.truncf %24 : vector<8x128xf32> to vector<8x128xbf16>
    %cst_22 = arith.constant dense<0.000000e+00> : vector<8x64xf32>
    %28 = tpu.matmul %27, %25, %cst_22 {dimension_numbers = #tpu.dot_dimension_numbers<[1], [0], [0], [1], [0, 0, 1, 1], [], []>} : vector<8x128xbf16>, vector<128x64xbf16>, vector<8x64xf32> -> vector<8x64xf32>
    %29 = vector.broadcast %26 : vector<1x64xf32> to vector<8x64xf32>
    %30 = arith.addf %28, %29 : vector<8x64xf32>
    %cst_23 = arith.constant 0.000000e+00 : f32
    %31 = vector.broadcast %cst_23 : f32 to vector<8x64xf32>
    %32 = arith.maximumf %30, %31 : vector<8x64xf32>
    %c0_24 = arith.constant 0 : index
    %c0_25 = arith.constant 0 : index
    %33 = vector.load %arg10[%c0_24, %c0_25] : memref<64x32xbf16, #tpu.memory_space<vmem>>, vector<64x32xbf16>
    %c0_26 = arith.constant 0 : index
    %c0_27 = arith.constant 0 : index
    %34 = vector.load %arg11[%c0_26, %c0_27] : memref<1x32xf32, #tpu.memory_space<vmem>>, vector<1x32xf32>
    %35 = arith.truncf %32 : vector<8x64xf32> to vector<8x64xbf16>
    %cst_28 = arith.constant dense<0.000000e+00> : vector<8x32xf32>
    %36 = tpu.matmul %35, %33, %cst_28 {dimension_numbers = #tpu.dot_dimension_numbers<[1], [0], [0], [1], [0, 0, 1, 1], [], []>} : vector<8x64xbf16>, vector<64x32xbf16>, vector<8x32xf32> -> vector<8x32xf32>
    %37 = vector.broadcast %34 : vector<1x32xf32> to vector<8x32xf32>
    %38 = arith.addf %36, %37 : vector<8x32xf32>
    %cst_29 = arith.constant 0.000000e+00 : f32
    %39 = vector.broadcast %cst_29 : f32 to vector<8x32xf32>
    %40 = arith.maximumf %38, %39 : vector<8x32xf32>
    %c0_30 = arith.constant 0 : index
    %c0_31 = arith.constant 0 : index
    %41 = vector.load %arg12[%c0_30, %c0_31] : memref<32x24xbf16, #tpu.memory_space<vmem>>, vector<32x24xbf16>
    %c0_32 = arith.constant 0 : index
    %c0_33 = arith.constant 0 : index
    %42 = vector.load %arg13[%c0_32, %c0_33] : memref<1x24xf32, #tpu.memory_space<vmem>>, vector<1x24xf32>
    %43 = arith.truncf %40 : vector<8x32xf32> to vector<8x32xbf16>
    %cst_34 = arith.constant dense<0.000000e+00> : vector<8x24xf32>
    %44 = tpu.matmul %43, %41, %cst_34 {dimension_numbers = #tpu.dot_dimension_numbers<[1], [0], [0], [1], [0, 0, 1, 1], [], []>} : vector<8x32xbf16>, vector<32x24xbf16>, vector<8x24xf32> -> vector<8x24xf32>
    %45 = vector.broadcast %42 : vector<1x24xf32> to vector<8x24xf32>
    %46 = arith.addf %44, %45 : vector<8x24xf32>
    %cst_35 = arith.constant 0.000000e+00 : f32
    %47 = vector.broadcast %cst_35 : f32 to vector<8x24xf32>
    %48 = arith.maximumf %46, %47 : vector<8x24xf32>
    %c0_36 = arith.constant 0 : index
    %c0_37 = arith.constant 0 : index
    %49 = vector.load %arg14[%c0_36, %c0_37] : memref<24x24xbf16, #tpu.memory_space<vmem>>, vector<24x24xbf16>
    %c0_38 = arith.constant 0 : index
    %c0_39 = arith.constant 0 : index
    %50 = vector.load %arg15[%c0_38, %c0_39] : memref<1x24xf32, #tpu.memory_space<vmem>>, vector<1x24xf32>
    %51 = arith.truncf %48 : vector<8x24xf32> to vector<8x24xbf16>
    %cst_40 = arith.constant dense<0.000000e+00> : vector<8x24xf32>
    %52 = tpu.matmul %51, %49, %cst_40 {dimension_numbers = #tpu.dot_dimension_numbers<[1], [0], [0], [1], [0, 0, 1, 1], [], []>} : vector<8x24xbf16>, vector<24x24xbf16>, vector<8x24xf32> -> vector<8x24xf32>
    %53 = vector.broadcast %50 : vector<1x24xf32> to vector<8x24xf32>
    %54 = arith.addf %52, %53 : vector<8x24xf32>
    %cst_41 = arith.constant 0.000000e+00 : f32
    %55 = vector.broadcast %cst_41 : f32 to vector<8x24xf32>
    %56 = arith.maximumf %54, %55 : vector<8x24xf32>
    %c0_42 = arith.constant 0 : index
    %c0_43 = arith.constant 0 : index
    %57 = vector.load %arg16[%c0_42, %c0_43] : memref<24x24xbf16, #tpu.memory_space<vmem>>, vector<24x24xbf16>
    %c0_44 = arith.constant 0 : index
    %c0_45 = arith.constant 0 : index
    %58 = vector.load %arg17[%c0_44, %c0_45] : memref<1x24xf32, #tpu.memory_space<vmem>>, vector<1x24xf32>
    %59 = arith.truncf %56 : vector<8x24xf32> to vector<8x24xbf16>
    %cst_46 = arith.constant dense<0.000000e+00> : vector<8x24xf32>
    %60 = tpu.matmul %59, %57, %cst_46 {dimension_numbers = #tpu.dot_dimension_numbers<[1], [0], [0], [1], [0, 0, 1, 1], [], []>} : vector<8x24xbf16>, vector<24x24xbf16>, vector<8x24xf32> -> vector<8x24xf32>
    %61 = vector.broadcast %58 : vector<1x24xf32> to vector<8x24xf32>
    %62 = arith.addf %60, %61 : vector<8x24xf32>
    %cst_47 = arith.constant 0.000000e+00 : f32
    %63 = vector.broadcast %cst_47 : f32 to vector<8x24xf32>
    %64 = arith.maximumf %62, %63 : vector<8x24xf32>
    %c0_48 = arith.constant 0 : index
    %c0_49 = arith.constant 0 : index
    %65 = vector.load %arg18[%c0_48, %c0_49] : memref<24x24xbf16, #tpu.memory_space<vmem>>, vector<24x24xbf16>
    %c0_50 = arith.constant 0 : index
    %c0_51 = arith.constant 0 : index
    %66 = vector.load %arg19[%c0_50, %c0_51] : memref<1x24xf32, #tpu.memory_space<vmem>>, vector<1x24xf32>
    %67 = arith.truncf %64 : vector<8x24xf32> to vector<8x24xbf16>
    %cst_52 = arith.constant dense<0.000000e+00> : vector<8x24xf32>
    %68 = tpu.matmul %67, %65, %cst_52 {dimension_numbers = #tpu.dot_dimension_numbers<[1], [0], [0], [1], [0, 0, 1, 1], [], []>} : vector<8x24xbf16>, vector<24x24xbf16>, vector<8x24xf32> -> vector<8x24xf32>
    %69 = vector.broadcast %66 : vector<1x24xf32> to vector<8x24xf32>
    %70 = arith.addf %68, %69 : vector<8x24xf32>
    %cst_53 = arith.constant 0.000000e+00 : f32
    %71 = vector.broadcast %cst_53 : f32 to vector<8x24xf32>
    %72 = arith.maximumf %70, %71 : vector<8x24xf32>
    %c0_54 = arith.constant 0 : index
    %c0_55 = arith.constant 0 : index
    %73 = vector.load %arg20[%c0_54, %c0_55] : memref<24x10xbf16, #tpu.memory_space<vmem>>, vector<24x10xbf16>
    %c0_56 = arith.constant 0 : index
    %c0_57 = arith.constant 0 : index
    %74 = vector.load %arg21[%c0_56, %c0_57] : memref<1x10xf32, #tpu.memory_space<vmem>>, vector<1x10xf32>
    %75 = arith.truncf %72 : vector<8x24xf32> to vector<8x24xbf16>
    %cst_58 = arith.constant dense<0.000000e+00> : vector<8x10xf32>
    %76 = tpu.matmul %75, %73, %cst_58 {dimension_numbers = #tpu.dot_dimension_numbers<[1], [0], [0], [1], [0, 0, 1, 1], [], []>} : vector<8x24xbf16>, vector<24x10xbf16>, vector<8x10xf32> -> vector<8x10xf32>
    %77 = vector.broadcast %74 : vector<1x10xf32> to vector<8x10xf32>
    %78 = arith.addf %76, %77 : vector<8x10xf32>
    %cst_59 = arith.constant dense<0xFF800000> : vector<8xf32>
    %79 = vector.multi_reduction <maximumf>, %78, %cst_59 [1] : vector<8x10xf32> to vector<8xf32>
    %80 = vector.shape_cast %79 : vector<8xf32> to vector<8x1xf32>
    %81 = vector.broadcast %80 : vector<8x1xf32> to vector<8x10xf32>
    %82 = arith.subf %78, %81 : vector<8x10xf32>
    %83 = math.exp %82 : vector<8x10xf32>
    %cst_60 = arith.constant dense<0.000000e+00> : vector<8xf32>
    %84 = vector.multi_reduction <add>, %83, %cst_60 [1] : vector<8x10xf32> to vector<8xf32>
    %85 = vector.shape_cast %84 : vector<8xf32> to vector<8x1xf32>
    %86 = tpu.reciprocal %85 {approx = true} : vector<8x1xf32> -> vector<8x1xf32>
    %87 = arith.mulf %85, %86 : vector<8x1xf32>
    %cst_61 = arith.constant 2.000000e+00 : f32
    %88 = vector.broadcast %cst_61 : f32 to vector<8x1xf32>
    %89 = arith.subf %88, %87 : vector<8x1xf32>
    %90 = arith.mulf %86, %89 : vector<8x1xf32>
    %91 = vector.broadcast %90 : vector<8x1xf32> to vector<8x10xf32>
    %92 = arith.mulf %83, %91 : vector<8x10xf32>
    %c0_62 = arith.constant 0 : index
    %c0_63 = arith.constant 0 : index
    %93 = vector.load %arg22[%c0_62, %c0_63] : memref<8x10xf32, #tpu.memory_space<vmem>>, vector<8x10xf32>
    tpu.vector_store %arg22[%c0_62, %c0_63], %92 {strides = array<i32>} : memref<8x10xf32, #tpu.memory_space<vmem>>, vector<8x10xf32>,
    return
  }
  func.func @transform_0(%arg0: i32) -> (i32, i32) {
    %c0_i32 = arith.constant 0 : i32
    %c0_i32_0 = arith.constant 0 : i32
    return %arg0, %c0_i32 : i32, i32
  }
  func.func @transform_1(%arg0: i32) -> (i32, i32) {
    %c0_i32 = arith.constant 0 : i32
    %c0_i32_0 = arith.constant 0 : i32
    %c0_i32_1 = arith.constant 0 : i32
    return %c0_i32, %c0_i32_0 : i32, i32
  }
  func.func @transform_2(%arg0: i32) -> (i32, i32) {
    %c0_i32 = arith.constant 0 : i32
    %c0_i32_0 = arith.constant 0 : i32
    %c0_i32_1 = arith.constant 0 : i32
    return %c0_i32, %c0_i32_0 : i32, i32
  }
  func.func @transform_3(%arg0: i32) -> (i32, i32) {
    %c0_i32 = arith.constant 0 : i32
    %c0_i32_0 = arith.constant 0 : i32
    %c0_i32_1 = arith.constant 0 : i32
    return %c0_i32, %c0_i32_0 : i32, i32
  }
  func.func @transform_4(%arg0: i32) -> (i32, i32) {
    %c0_i32 = arith.constant 0 : i32
    %c0_i32_0 = arith.constant 0 : i32
    %c0_i32_1 = arith.constant 0 : i32
    return %c0_i32, %c0_i32_0 : i32, i32
  }
  func.func @transform_5(%arg0: i32) -> (i32, i32) {
    %c0_i32 = arith.constant 0 : i32
    %c0_i32_0 = arith.constant 0 : i32
    %c0_i32_1 = arith.constant 0 : i32
    return %c0_i32, %c0_i32_0 : i32, i32
  }
  func.func @transform_6(%arg0: i32) -> (i32, i32) {
    %c0_i32 = arith.constant 0 : i32
    %c0_i32_0 = arith.constant 0 : i32
    %c0_i32_1 = arith.constant 0 : i32
    return %c0_i32, %c0_i32_0 : i32, i32
  }
  func.func @transform_7(%arg0: i32) -> (i32, i32) {
    %c0_i32 = arith.constant 0 : i32
    %c0_i32_0 = arith.constant 0 : i32
    %c0_i32_1 = arith.constant 0 : i32
    return %c0_i32, %c0_i32_0 : i32, i32
  }
  func.func @transform_8(%arg0: i32) -> (i32, i32) {
    %c0_i32 = arith.constant 0 : i32
    %c0_i32_0 = arith.constant 0 : i32
    %c0_i32_1 = arith.constant 0 : i32
    return %c0_i32, %c0_i32_0 : i32, i32
  }
  func.func @transform_9(%arg0: i32) -> (i32, i32) {
    %c0_i32 = arith.constant 0 : i32
    %c0_i32_0 = arith.constant 0 : i32
    %c0_i32_1 = arith.constant 0 : i32
    return %c0_i32, %c0_i32_0 : i32, i32
  }
  func.func @transform_10(%arg0: i32) -> (i32, i32) {
    %c0_i32 = arith.constant 0 : i32
    %c0_i32_0 = arith.constant 0 : i32
    %c0_i32_1 = arith.constant 0 : i32
    return %c0_i32, %c0_i32_0 : i32, i32
  }
  func.func @transform_11(%arg0: i32) -> (i32, i32) {
    %c0_i32 = arith.constant 0 : i32
    %c0_i32_0 = arith.constant 0 : i32
    %c0_i32_1 = arith.constant 0 : i32
    return %c0_i32, %c0_i32_0 : i32, i32
  }
  func.func @transform_12(%arg0: i32) -> (i32, i32) {
    %c0_i32 = arith.constant 0 : i32
    %c0_i32_0 = arith.constant 0 : i32
    %c0_i32_1 = arith.constant 0 : i32
    return %c0_i32, %c0_i32_0 : i32, i32
  }
  func.func @transform_13(%arg0: i32) -> (i32, i32) {
    %c0_i32 = arith.constant 0 : i32
    %c0_i32_0 = arith.constant 0 : i32
    %c0_i32_1 = arith.constant 0 : i32
    return %c0_i32, %c0_i32_0 : i32, i32
  }
  func.func @transform_14(%arg0: i32) -> (i32, i32) {
    %c0_i32 = arith.constant 0 : i32
    %c0_i32_0 = arith.constant 0 : i32
    %c0_i32_1 = arith.constant 0 : i32
    return %c0_i32, %c0_i32_0 : i32, i32
  }
  func.func @transform_15(%arg0: i32) -> (i32, i32) {
    %c0_i32 = arith.constant 0 : i32
    %c0_i32_0 = arith.constant 0 : i32
    %c0_i32_1 = arith.constant 0 : i32
    return %c0_i32, %c0_i32_0 : i32, i32
  }
  func.func @transform_16(%arg0: i32) -> (i32, i32) {
    %c0_i32 = arith.constant 0 : i32
    %c0_i32_0 = arith.constant 0 : i32
    %c0_i32_1 = arith.constant 0 : i32
    return %c0_i32, %c0_i32_0 : i32, i32
  }
  func.func @transform_17(%arg0: i32) -> (i32, i32) {
    %c0_i32 = arith.constant 0 : i32
    %c0_i32_0 = arith.constant 0 : i32
    %c0_i32_1 = arith.constant 0 : i32
    return %c0_i32, %c0_i32_0 : i32, i32
  }
  func.func @transform_18(%arg0: i32) -> (i32, i32) {
    %c0_i32 = arith.constant 0 : i32
    %c0_i32_0 = arith.constant 0 : i32
    %c0_i32_1 = arith.constant 0 : i32
    return %c0_i32, %c0_i32_0 : i32, i32
  }
  func.func @transform_19(%arg0: i32) -> (i32, i32) {
    %c0_i32 = arith.constant 0 : i32
    %c0_i32_0 = arith.constant 0 : i32
    %c0_i32_1 = arith.constant 0 : i32
    return %c0_i32, %c0_i32_0 : i32, i32
  }
  func.func @transform_20(%arg0: i32) -> (i32, i32) {
    %c0_i32 = arith.constant 0 : i32
    %c0_i32_0 = arith.constant 0 : i32
    %c0_i32_1 = arith.constant 0 : i32
    return %c0_i32, %c0_i32_0 : i32, i32
  }
  func.func @transform_21(%arg0: i32) -> (i32, i32) {
    %c0_i32 = arith.constant 0 : i32
    %c0_i32_0 = arith.constant 0 : i32
    return %arg0, %c0_i32 : i32, i32
  }
}

</mosaic_0001>

<bundles_post_ra>
// kernel: net_v4_forward.1
= control target key start
LH: loop header
LB: loop body
LE: loop exit
PB: predicated region body
PF: predicated region fallthrough
CT: control target
= control target key end

     0   :  { %s4927_s0 = inlined_call_operand.vmem [shape: f32[8,784], index: 0, kind: input, shape index: {}]   ;;  %s4928_s1 = inlined_call_operand.vmem [shape: bf16[784,512], index: 1, kind: input, shape index: {}]   ;;  %s4929_s2 = inlined_call_operand.vmem [shape: f32[1,512], index: 2, kind: input, shape index: {}]   ;;  %s4930_s3 = inlined_call_operand.vmem [shape: bf16[512,256], index: 3, kind: input, shape index: {}]   ;;  %s4931_s4 = inlined_call_operand.vmem [shape: f32[1,256], index: 4, kind: input, shape index: {}]   ;;  %s4932_s5 = inlined_call_operand.vmem [shape: bf16[256,128], index: 5, kind: input, shape index: {}]   ;;  %s4933_s6 = inlined_call_operand.vmem [shape: f32[1,128], index: 6, kind: input, shape index: {}]   ;;  %s4934_s7 = inlined_call_operand.vmem [shape: bf16[128,64], index: 7, kind: input, shape index: {}]   ;;  %s4935_s8 = inlined_call_operand.vmem [shape: f32[1,64], index: 8, kind: input, shape index: {}]   ;;  %s4936_s9 = inlined_call_operand.vmem [shape: bf16[64,32], index: 9, kind: input, shape index: {}]   ;;  %s4937_s10 = inlined_call_operand.vmem [shape: f32[1,32], index: 10, kind: input, shape index: {}]   ;;  %s4938_s11 = inlined_call_operand.vmem [shape: bf16[32,24], index: 11, kind: input, shape index: {}]   ;;  %s4939_s12 = inlined_call_operand.vmem [shape: f32[1,24], index: 12, kind: input, shape index: {}]   ;;  %s4940_s13 = inlined_call_operand.vmem [shape: bf16[24,24], index: 13, kind: input, shape index: {}]   ;;  %s4941_s14 = inlined_call_operand.vmem [shape: f32[1,24], index: 14, kind: input, shape index: {}]   ;;  %s4942_s15 = inlined_call_operand.vmem [shape: bf16[24,24], index: 15, kind: input, shape index: {}]   ;;  %s4943_s16 = inlined_call_operand.vmem [shape: f32[1,24], index: 16, kind: input, shape index: {}]   ;;  %s4944_s17 = inlined_call_operand.vmem [shape: bf16[24,24], index: 17, kind: input, shape index: {}]   ;;  %s4945_s18 = inlined_call_operand.vmem [shape: f32[1,24], index: 18, kind: input, shape index: {}]   ;;  %s4946_s19 = inlined_call_operand.vmem [shape: bf16[24,10], index: 19, kind: input, shape index: {}]   ;;  %s4947_s20 = inlined_call_operand.vmem [shape: f32[1,10], index: 20, kind: input, shape index: {}]   ;;  %s4948_s21 = inlined_call_operand.hbm [shape: f32[8,10], index: 21, kind: output, shape index: {}]  }
   0x1   :  { %4953 = sst [smem:[#allocation5_spill]] %s4927_s0 }
   0x2   :  { %4954 = sst [smem:[#allocation6_spill]] %s4928_s1 }
   0x3   :  { %4955 = sst [smem:[#allocation7_spill]] %s4929_s2 }
   0x4   :  { %4956 = sst [smem:[#allocation8_spill]] %s4930_s3 }
   0x5   :  { %4957 = sst [smem:[#allocation9_spill]] %s4931_s4 }
   0x6   :  { %4958 = sst [smem:[#allocation10_spill]] %s4932_s5 }
   0x7   :  { %s4959_s26 = sld [smem:[#allocation6_spill]]  ;;  %v3775_v2 = vmov 0   ;;  %s4960_s28 = sld [smem:[#allocation5_spill]]  ;;  %vm1282_vm0 = vcmask 130048  }
   0x8   :  { %1441 = vmatprep.mubr.bf16.mxu1 %v3775_v2 }
   0xd   :  { %v3319_v0 = vld [vmem:[%s4959_s26 + $0x4] ss:$16 sps:$4 sm:$0xff]   ;;  %v3323_v3 = vld [vmem:[%s4959_s26] ss:$16 sps:$4 sm:$0xff]   ;;  %v3327_v6 = vld [vmem:[%s4959_s26 + $0x8] ss:$16 sps:$4 sm:$0xff]  }
   0xe   :  { %v3321_v1 = vld [vmem:[%s4959_s26 + $0x604] ss:$16 sps:$4 sm:$0xff]   ;;  %1286 = vmatprep.subr.bf16.mxu0 %v3319_v0  ;;  %v3324_v4 = vld [vmem:[%s4959_s26 + $0x600] ss:$16 sps:$4 sm:$0xff]   ;;  %v3329_v7 = vld [vmem:[%s4959_s26 + $0xc] ss:$16 sps:$4 sm:$0xff]  }
   0xf   :  { %1409 = vmatprep.subr.bf16.mxu1 %v3321_v1  ;;  %v3325_v5 = vld [vmem:[%s4959_s26 + $0x24] ss:$16 sps:$4 sm:$0xff]   ;;  %1287 = vmatpush1.bf16.msra.mxu0 %v3323_v3  ;;  %v3330_v8 = vld [vmem:[%s4959_s26 + $0x20] ss:$16 sps:$4 sm:$0xff]   ;;  %v3333_v12 = vld [vmem:[%s4959_s26 + $0x28] ss:$16 sps:$4 sm:$0xff]  }
  0x10   :  { %1410 = vmatpush1.bf16.msra.mxu1 %v3324_v4  ;;  %1288 = vmatprep.subr.bf16.mxu0 %v3325_v5  ;;  %v76_v9 = vld [vmem:[%s4960_s28 + $0x30] sm:$0xff]  ;;  %v3335_v13 = vld [vmem:[%s4959_s26 + $0x2c] ss:$16 sps:$4 sm:$0xff]   ;;  %v3339_v18 = vld [vmem:[%s4959_s26 + $0x48] ss:$16 sps:$4 sm:$0xff]  }
  0x11   :  { %1450 = vmatprep.subr.bf16.mxu1 %v3329_v7  ;;  %v3917_v10 = vpack.c.bf16 %v76_v9, %v76_v9  ;;  %v3331_v11 = vld [vmem:[%s4959_s26 + $0x44] ss:$16 sps:$4 sm:$0xff]   ;;  %v3336_v14 = vld [vmem:[%s4959_s26 + $0x40] ss:$16 sps:$4 sm:$0xff]   ;;  %v3341_v16 = vld [vmem:[%s4959_s26 + $0x4c] ss:$16 sps:$4 sm:$0xff]  }
  0x12   :  { %v3337_v15 = vld [vmem:[%s4959_s26 + $0x64] ss:$16 sps:$4 sm:$0xff]   ;;  %v3342_v17 = vld [vmem:[%s4959_s26 + $0x60] ss:$16 sps:$4 sm:$0xff]   ;;  %v3347_v20 = vld [vmem:[%s4959_s26 + $0x6c] ss:$16 sps:$4 sm:$0xff]  }
  0x13   :  { %1289 = vmatpush1.bf16.msra.mxu0 %v3330_v8  ;;  %3042 = vmatmul.mubr.msk.bf16.vlgmr.msra.gmra.mrb[0].mxu1 %vm1282_vm0, %v3917_v10  ;;  %v3343_v19 = vld [vmem:[%s4959_s26 + $0x84] ss:$16 sps:$4 sm:$0xff]   ;;  %v3345_v21 = vld [vmem:[%s4959_s26 + $0x68] ss:$16 sps:$4 sm:$0xff]   ;;  %v3348_v22 = vld [vmem:[%s4959_s26 + $0x80] ss:$16 sps:$4 sm:$0xff]  }
  0x14   :  { %1451 = vmatpush1.bf16.msra.mxu1 %v3327_v6  ;;  %1290 = vmatprep.subr.bf16.mxu0 %v3331_v11  ;;  %v3349_v23 = vld [vmem:[%s4959_s26 + $0xa4] ss:$16 sps:$4 sm:$0xff]   ;;  %v3353_v24 = vld [vmem:[%s4959_s26 + $0x8c] ss:$16 sps:$4 sm:$0xff]   ;;  %v3354_v25 = vld [vmem:[%s4959_s26 + $0xa0] ss:$16 sps:$4 sm:$0xff]  }
  0x15   :  { %1452 = vmatprep.subr.bf16.mxu1 %v3335_v13  ;;  %v3351_v26 = vld [vmem:[%s4959_s26 + $0x88] ss:$16 sps:$4 sm:$0xff]   ;;  %v3355_v27 = vld [vmem:[%s4959_s26 + $0xc4] ss:$16 sps:$4 sm:$0xff]   ;;  %v3359_v28 = vld [vmem:[%s4959_s26 + $0xac] ss:$16 sps:$4 sm:$0xff]  }
  0x16   :  { %v3357_v29 = vld [vmem:[%s4959_s26 + $0xa8] ss:$16 sps:$4 sm:$0xff]   ;;  %v3360_v30 = vld [vmem:[%s4959_s26 + $0xc0] ss:$16 sps:$4 sm:$0xff]   ;;  %v3361_v31 = vld [vmem:[%s4959_s26 + $0xe4] ss:$16 sps:$4 sm:$0xff]  }
  0x17   :  { %1291 = vmatpush1.bf16.msra.mxu0 %v3336_v14  ;;  %v3365_v32 = vld [vmem:[%s4959_s26 + $0xcc] ss:$16 sps:$4 sm:$0xff]   ;;  %v3366_v33 = vld [vmem:[%s4959_s26 + $0xe0] ss:$16 sps:$4 sm:$0xff]   ;;  %v3363_v34 = vld [vmem:[%s4959_s26 + $0xc8] ss:$16 sps:$4 sm:$0xff]  }
  0x18   :  { %1453 = vmatpush1.bf16.msra.mxu1 %v3333_v12  ;;  %1292 = vmatprep.subr.bf16.mxu0 %v3337_v15  ;;  %v3367_v35 = vld [vmem:[%s4959_s26 + $0x104] ss:$16 sps:$4 sm:$0xff]   ;;  %v3371_v36 = vld [vmem:[%s4959_s26 + $0xec] ss:$16 sps:$4 sm:$0xff]   ;;  %v3369_v37 = vld [vmem:[%s4959_s26 + $0xe8] ss:$16 sps:$4 sm:$0xff]  }
  0x19   :  { %1454 = vmatprep.subr.bf16.mxu1 %v3341_v16  ;;  %v3372_v38 = vld [vmem:[%s4959_s26 + $0x100] ss:$16 sps:$4 sm:$0xff]   ;;  %v3373_v39 = vld [vmem:[%s4959_s26 + $0x124] ss:$16 sps:$4 sm:$0xff]   ;;  %v3377_v40 = vld [vmem:[%s4959_s26 + $0x10c] ss:$16 sps:$4 sm:$0xff]  }
  0x1a   :  { %v3378_v41 = vld [vmem:[%s4959_s26 + $0x120] ss:$16 sps:$4 sm:$0xff]   ;;  %v3375_v42 = vld [vmem:[%s4959_s26 + $0x108] ss:$16 sps:$4 sm:$0xff]   ;;  %v3379_v43 = vld [vmem:[%s4959_s26 + $0x144] ss:$16 sps:$4 sm:$0xff]  }
  0x1b   :  { %1293 = vmatpush1.bf16.msra.mxu0 %v3342_v17  ;;  %v3383_v44 = vld [vmem:[%s4959_s26 + $0x12c] ss:$16 sps:$4 sm:$0xff]   ;;  %v3381_v45 = vld [vmem:[%s4959_s26 + $0x128] ss:$16 sps:$4 sm:$0xff]   ;;  %v3384_v46 = vld [vmem:[%s4959_s26 + $0x140] ss:$16 sps:$4 sm:$0xff]  }
  0x1c   :  { %1455 = vmatpush1.bf16.msra.mxu1 %v3339_v18  ;;  %1294 = vmatprep.subr.bf16.mxu0 %v3343_v19  ;;  %v3385_v47 = vld [vmem:[%s4959_s26 + $0x164] ss:$16 sps:$4 sm:$0xff]   ;;  %v3389_v48 = vld [vmem:[%s4959_s26 + $0x14c] ss:$16 sps:$4 sm:$0xff]   ;;  %v3390_v50 = vld [vmem:[%s4959_s26 + $0x160] ss:$16 sps:$4 sm:$0xff]  }
  0x1d   :  { %1456 = vmatprep.subr.bf16.mxu1 %v3347_v20  ;;  %v71_v49 = vld [vmem:[%s4960_s28 + $0x8] sm:$0xff]  ;;  %v3391_v53 = vld [vmem:[%s4959_s26 + $0x184] ss:$16 sps:$4 sm:$0xff]   ;;  %v3396_v56 = vld [vmem:[%s4959_s26 + $0x180] ss:$16 sps:$4 sm:$0xff]  }
  0x1e   :  { %v275_v51 = vpack.c.bf16 %v71_v49, %v71_v49  ;;  %v3387_v52 = vld [vmem:[%s4959_s26 + $0x148] ss:$16 sps:$4 sm:$0xff]   ;;  %v3395_v54 = vld [vmem:[%s4959_s26 + $0x16c] ss:$16 sps:$4 sm:$0xff]   ;;  %v3397_v57 = vld [vmem:[%s4959_s26 + $0x1a4] ss:$16 sps:$4 sm:$0xff]  }
  0x1f   :  { %1295 = vmatpush1.bf16.msra.mxu0 %v3348_v22  ;;  %v3393_v55 = vld [vmem:[%s4959_s26 + $0x168] ss:$16 sps:$4 sm:$0xff]   ;;  %v3401_v58 = vld [vmem:[%s4959_s26 + $0x18c] ss:$16 sps:$4 sm:$0xff]   ;;  %v3402_v60 = vld [vmem:[%s4959_s26 + $0x1a0] ss:$16 sps:$4 sm:$0xff]  }
  0x20   :  { %1457 = vmatpush1.bf16.msra.mxu1 %v3345_v21  ;;  %1296 = vmatprep.subr.bf16.mxu0 %v3349_v23  ;;  %v3399_v59 = vld [vmem:[%s4959_s26 + $0x188] ss:$16 sps:$4 sm:$0xff]   ;;  %v3403_v61 = vld [vmem:[%s4959_s26 + $0x1c4] ss:$16 sps:$4 sm:$0xff]   ;;  %v3407_v62 = vld [vmem:[%s4959_s26 + $0x1ac] ss:$16 sps:$4 sm:$0xff]  }
  0x21   :  { %1458 = vmatprep.subr.bf16.mxu1 %v3353_v24  ;;  %1318 = vmatprep.mubr.bf16.mxu0 %v275_v51  ;;  %v3405_v63 = vld [vmem:[%s4959_s26 + $0x1a8] ss:$16 sps:$4 sm:$0xff]   ;;  %v3408_v0 = vld [vmem:[%s4959_s26 + $0x1c0] ss:$16 sps:$4 sm:$0xff]   ;;  %v3409_v1 = vld [vmem:[%s4959_s26 + $0x1e4] ss:$16 sps:$4 sm:$0xff]  }
  0x22   :  { %1482 = vmatprep.mubr.bf16.mxu1 %v275_v51  ;;  %v3413_v3 = vld [vmem:[%s4959_s26 + $0x1cc] ss:$16 sps:$4 sm:$0xff]   ;;  %v3411_v4 = vld [vmem:[%s4959_s26 + $0x1c8] ss:$16 sps:$4 sm:$0xff]   ;;  %v3414_v5 = vld [vmem:[%s4959_s26 + $0x1e0] ss:$16 sps:$4 sm:$0xff]  }
  0x23   :  { %1297 = vmatpush1.bf16.msra.mxu0 %v3354_v25  ;;  %v70_v6 = vld [vmem:[%s4960_s28] sm:$0xff]  ;;  %v3420_v8 = vld [vmem:[%s4959_s26 + $0x1ec] ss:$16 sps:$4 sm:$0xff]   ;;  %v3418_v12 = vld [vmem:[%s4959_s26 + $0x1e8] ss:$16 sps:$4 sm:$0xff]  }
  0x24   :  { %1459 = vmatpush1.bf16.msra.mxu1 %v3351_v26  ;;  %1298 = vmatprep.subr.bf16.mxu0 %v3355_v27  ;;  %v3417_v7 = vld [vmem:[%s4959_s26 + $0x204] ss:$16 sps:$4 sm:$0xff]   ;;  %v274_v9 = vpack.c.bf16 %v70_v6, %v70_v6  ;;  %v3415_v11 = vld [vmem:[%s4959_s26 + $0x200] ss:$16 sps:$4 sm:$0xff]   ;;  %v3426_v14 = vld [vmem:[%s4959_s26 + $0x20c] ss:$16 sps:$4 sm:$0xff]  }
  0x25   :  { %1460 = vmatprep.subr.bf16.mxu1 %v3359_v28  ;;  %v3423_v13 = vld [vmem:[%s4959_s26 + $0x224] ss:$16 sps:$4 sm:$0xff]   ;;  %v3421_v15 = vld [vmem:[%s4959_s26 + $0x220] ss:$16 sps:$4 sm:$0xff]   ;;  %v3424_v16 = vld [vmem:[%s4959_s26 + $0x208] ss:$16 sps:$4 sm:$0xff]  }
  0x26   :  { %v3429_v17 = vld [vmem:[%s4959_s26 + $0x244] ss:$16 sps:$4 sm:$0xff]   ;;  %v3432_v18 = vld [vmem:[%s4959_s26 + $0x22c] ss:$16 sps:$4 sm:$0xff]   ;;  %v3427_v19 = vld [vmem:[%s4959_s26 + $0x240] ss:$16 sps:$4 sm:$0xff]  }
  0x27   :  { %1299 = vmatpush1.bf16.msra.mxu0 %v3360_v30  ;;  %v3430_v20 = vld [vmem:[%s4959_s26 + $0x228] ss:$16 sps:$4 sm:$0xff]   ;;  %v3435_v21 = vld [vmem:[%s4959_s26 + $0x264] ss:$16 sps:$4 sm:$0xff]   ;;  %v3438_v22 = vld [vmem:[%s4959_s26 + $0x24c] ss:$16 sps:$4 sm:$0xff]  }
  0x28   :  { %1461 = vmatpush1.bf16.msra.mxu1 %v3357_v29  ;;  %1300 = vmatprep.subr.bf16.mxu0 %v3361_v31  ;;  %v3433_v23 = vld [vmem:[%s4959_s26 + $0x260] ss:$16 sps:$4 sm:$0xff]   ;;  %v3436_v24 = vld [vmem:[%s4959_s26 + $0x248] ss:$16 sps:$4 sm:$0xff]   ;;  %v3441_v25 = vld [vmem:[%s4959_s26 + $0x284] ss:$16 sps:$4 sm:$0xff]  }
  0x29   :  { %1462 = vmatprep.subr.bf16.mxu1 %v3365_v32  ;;  %v3444_v26 = vld [vmem:[%s4959_s26 + $0x26c] ss:$16 sps:$4 sm:$0xff]   ;;  %v3439_v27 = vld [vmem:[%s4959_s26 + $0x280] ss:$16 sps:$4 sm:$0xff]   ;;  %v3442_v28 = vld [vmem:[%s4959_s26 + $0x268] ss:$16 sps:$4 sm:$0xff]  }
  0x2a   :  { %v3447_v29 = vld [vmem:[%s4959_s26 + $0x2a4] ss:$16 sps:$4 sm:$0xff]   ;;  %v3450_v30 = vld [vmem:[%s4959_s26 + $0x28c] ss:$16 sps:$4 sm:$0xff]   ;;  %v3445_v31 = vld [vmem:[%s4959_s26 + $0x2a0] ss:$16 sps:$4 sm:$0xff]  }
  0x2b   :  { %1301 = vmatpush1.bf16.msra.mxu0 %v3366_v33  ;;  %v3448_v32 = vld [vmem:[%s4959_s26 + $0x288] ss:$16 sps:$4 sm:$0xff]   ;;  %v3453_v33 = vld [vmem:[%s4959_s26 + $0x2c4] ss:$16 sps:$4 sm:$0xff]   ;;  %v3469_v49 = vld [vmem:[%s4959_s26 + $0x320] ss:$16 sps:$4 sm:$0xff]  }
  0x2c   :  { %1463 = vmatpush1.bf16.msra.mxu1 %v3363_v34  ;;  %1302 = vmatprep.subr.bf16.mxu0 %v3367_v35  ;;  %v3456_v34 = vld [vmem:[%s4959_s26 + $0x2ac] ss:$16 sps:$4 sm:$0xff]   ;;  %v3477_v51 = vld [vmem:[%s4959_s26 + $0x344] ss:$16 sps:$4 sm:$0xff]   ;;  %v3499_v6 = vld [vmem:[%s4959_s26 + $0x3c0] ss:$16 sps:$4 sm:$0xff]  }
  0x2d   :  { %1464 = vmatprep.subr.bf16.mxu1 %v3371_v36  ;;  %v73_v35 = vld [vmem:[%s4960_s28 + $0x18] sm:$0xff] }
  0x2e   :  { %v277_v36 = vpack.c.bf16 %v73_v35, %v73_v35  ;;  %v3535_v35 = vld [vmem:[%s4959_s26 + $0x480] ss:$16 sps:$4 sm:$0xff]  }
  0x2f   :  { %1303 = vmatpush1.bf16.msra.mxu0 %v3372_v38  ;;  %v3454_v38 = vld [vmem:[%s4959_s26 + $0x2a8] ss:$16 sps:$4 sm:$0xff]  }
  0x30   :  { %1465 = vmatpush1.bf16.msra.mxu1 %v3369_v37  ;;  %1304 = vmatprep.subr.bf16.mxu0 %v3373_v39  ;;  %v3451_v37 = vld [vmem:[%s4959_s26 + $0x2c0] ss:$16 sps:$4 sm:$0xff]   ;;  %v3459_v39 = vld [vmem:[%s4959_s26 + $0x2e4] ss:$16 sps:$4 sm:$0xff]  }
  0x31   :  { %1466 = vmatprep.subr.bf16.mxu1 %v3377_v40  ;;  %v3462_v40 = vld [vmem:[%s4959_s26 + $0x2cc] ss:$16 sps:$4 sm:$0xff]  }
  0x33   :  { %1305 = vmatpush1.bf16.msra.mxu0 %v3378_v41  ;;  %v3457_v41 = vld [vmem:[%s4959_s26 + $0x2e0] ss:$16 sps:$4 sm:$0xff]  }
  0x34   :  { %1467 = vmatpush1.bf16.msra.mxu1 %v3375_v42  ;;  %1306 = vmatprep.subr.bf16.mxu0 %v3379_v43  ;;  %v3460_v42 = vld [vmem:[%s4959_s26 + $0x2c8] ss:$16 sps:$4 sm:$0xff]   ;;  %v3465_v43 = vld [vmem:[%s4959_s26 + $0x304] ss:$16 sps:$4 sm:$0xff]  }
  0x35   :  { %1468 = vmatprep.subr.bf16.mxu1 %v3383_v44  ;;  %v3468_v44 = vld [vmem:[%s4959_s26 + $0x2ec] ss:$16 sps:$4 sm:$0xff]  }
  0x37   :  { %1307 = vmatpush1.bf16.msra.mxu0 %v3384_v46  ;;  %v3466_v46 = vld [vmem:[%s4959_s26 + $0x2e8] ss:$16 sps:$4 sm:$0xff]  }
  0x38   :  { %1469 = vmatpush1.bf16.msra.mxu1 %v3381_v45  ;;  %1308 = vmatprep.subr.bf16.mxu0 %v3385_v47  ;;  %v3463_v45 = vld [vmem:[%s4959_s26 + $0x300] ss:$16 sps:$4 sm:$0xff]   ;;  %v3471_v47 = vld [vmem:[%s4959_s26 + $0x324] ss:$16 sps:$4 sm:$0xff]  }
  0x39   :  { %1470 = vmatprep.subr.bf16.mxu1 %v3389_v48  ;;  %v3474_v48 = vld [vmem:[%s4959_s26 + $0x30c] ss:$16 sps:$4 sm:$0xff]  }
  0x3b   :  { %1309 = vmatpush1.bf16.msra.mxu0 %v3390_v50  ;;  %v3472_v50 = vld [vmem:[%s4959_s26 + $0x308] ss:$16 sps:$4 sm:$0xff]  }
  0x3c   :  { %1471 = vmatpush1.bf16.msra.mxu1 %v3387_v52  ;;  %1310 = vmatprep.subr.bf16.mxu0 %v3391_v53  ;;  %v3480_v52 = vld [vmem:[%s4959_s26 + $0x32c] ss:$16 sps:$4 sm:$0xff]   ;;  %v3475_v53 = vld [vmem:[%s4959_s26 + $0x340] ss:$16 sps:$4 sm:$0xff]  }
  0x3d   :  { %1472 = vmatprep.subr.bf16.mxu1 %v3395_v54  ;;  %v3478_v54 = vld [vmem:[%s4959_s26 + $0x328] ss:$16 sps:$4 sm:$0xff]  }
  0x3f   :  { %1311 = vmatpush1.bf16.msra.mxu0 %v3396_v56  ;;  %v3486_v56 = vld [vmem:[%s4959_s26 + $0x34c] ss:$16 sps:$4 sm:$0xff]  }
  0x40   :  { %1473 = vmatpush1.bf16.msra.mxu1 %v3393_v55  ;;  %1312 = vmatprep.subr.bf16.mxu0 %v3397_v57  ;;  %v3483_v55 = vld [vmem:[%s4959_s26 + $0x364] ss:$16 sps:$4 sm:$0xff]   ;;  %v3481_v57 = vld [vmem:[%s4959_s26 + $0x360] ss:$16 sps:$4 sm:$0xff]  }
  0x41   :  { %1474 = vmatprep.subr.bf16.mxu1 %v3401_v58  ;;  %v3484_v58 = vld [vmem:[%s4959_s26 + $0x348] ss:$16 sps:$4 sm:$0xff]  }
  0x43   :  { %1313 = vmatpush1.bf16.msra.mxu0 %v3402_v60  ;;  %v3492_v60 = vld [vmem:[%s4959_s26 + $0x36c] ss:$16 sps:$4 sm:$0xff]  }
  0x44   :  { %1475 = vmatpush1.bf16.msra.mxu1 %v3399_v59  ;;  %1314 = vmatprep.subr.bf16.mxu0 %v3403_v61  ;;  %v3489_v59 = vld [vmem:[%s4959_s26 + $0x384] ss:$16 sps:$4 sm:$0xff]   ;;  %v3487_v61 = vld [vmem:[%s4959_s26 + $0x380] ss:$16 sps:$4 sm:$0xff]  }
  0x45   :  { %1476 = vmatprep.subr.bf16.mxu1 %v3407_v62  ;;  %v3490_v62 = vld [vmem:[%s4959_s26 + $0x368] ss:$16 sps:$4 sm:$0xff]  }
  0x47   :  { %1315 = vmatpush1.bf16.msra.mxu0 %v3408_v0  ;;  %v3498_v0 = vld [vmem:[%s4959_s26 + $0x38c] ss:$16 sps:$4 sm:$0xff]  }
  0x48   :  { %1477 = vmatpush1.bf16.msra.mxu1 %v3405_v63  ;;  %1316 = vmatprep.subr.bf16.mxu0 %v3409_v1  ;;  %v3495_v63 = vld [vmem:[%s4959_s26 + $0x3a4] ss:$16 sps:$4 sm:$0xff]   ;;  %v3493_v1 = vld [vmem:[%s4959_s26 + $0x3a0] ss:$16 sps:$4 sm:$0xff]  }
  0x49   :  { %1478 = vmatprep.subr.bf16.mxu1 %v3413_v3  ;;  %v3496_v3 = vld [vmem:[%s4959_s26 + $0x388] ss:$16 sps:$4 sm:$0xff]  }
  0x4b   :  { %1317 = vmatpush1.bf16.msra.mxu0 %v3414_v5  ;;  %v3504_v5 = vld [vmem:[%s4959_s26 + $0x3ac] ss:$16 sps:$4 sm:$0xff]  }
  0x4c   :  { %1479 = vmatpush1.bf16.msra.mxu1 %v3411_v4  ;;  %1327 = vmatprep.subr.bf16.mxu0 %v3417_v7  ;;  %v3501_v4 = vld [vmem:[%s4959_s26 + $0x3c4] ss:$16 sps:$4 sm:$0xff]   ;;  %v3502_v7 = vld [vmem:[%s4959_s26 + $0x3a8] ss:$16 sps:$4 sm:$0xff]  }
  0x4d   :  { %1480 = vmatprep.subr.bf16.mxu1 %v3420_v8  ;;  %v3507_v8 = vld [vmem:[%s4959_s26 + $0x3e4] ss:$16 sps:$4 sm:$0xff]  }
  0x4e   :  { %1319 = vmatmul.mubr.bf16.vlgmr.msra.gmra.mrb[0].mxu0 %v274_v9 }
  0x4f   :  { %1328 = vmatpush1.bf16.msra.mxu0 %v3415_v11  ;;  %1359 = vmatprep.mubr.bf16.mxu0 %v277_v36  ;;  %v3505_v11 = vld [vmem:[%s4959_s26 + $0x3e0] ss:$16 sps:$4 sm:$0xff]  }
  0x50   :  { %1481 = vmatpush1.bf16.msra.mxu1 %v3418_v12  ;;  %1329 = vmatprep.subr.bf16.mxu0 %v3423_v13  ;;  %v72_v12 = vld [vmem:[%s4960_s28 + $0x10] sm:$0xff]  ;;  %v3508_v13 = vld [vmem:[%s4959_s26 + $0x3c8] ss:$16 sps:$4 sm:$0xff]  }
  0x51   :  { %1491 = vmatprep.subr.bf16.mxu1 %v3426_v14  ;;  %v3513_v14 = vld [vmem:[%s4959_s26 + $0x404] ss:$16 sps:$4 sm:$0xff]  }
  0x53   :  { %1330 = vmatpush1.bf16.msra.mxu0 %v3421_v15  ;;  %1483 = vmatmul.mubr.bf16.vlgmr.msra.gmra.mrb[4].mxu1 %v274_v9  ;;  %v3510_v9 = vld [vmem:[%s4959_s26 + $0x3cc] ss:$16 sps:$4 sm:$0xff]  }
  0x54   :  { %1492 = vmatpush1.bf16.msra.mxu1 %v3424_v16  ;;  %1331 = vmatprep.subr.bf16.mxu0 %v3429_v17  ;;  %v3516_v15 = vld [vmem:[%s4959_s26 + $0x3ec] ss:$16 sps:$4 sm:$0xff]   ;;  %v276_v16 = vpack.c.bf16 %v72_v12, %v72_v12  ;;  %v3511_v17 = vld [vmem:[%s4959_s26 + $0x400] ss:$16 sps:$4 sm:$0xff]  }
  0x55   :  { %1493 = vmatprep.subr.bf16.mxu1 %v3432_v18  ;;  %1523 = vmatprep.mubr.bf16.mxu1 %v277_v36  ;;  %v3514_v18 = vld [vmem:[%s4959_s26 + $0x3e8] ss:$16 sps:$4 sm:$0xff]   ;;  %v3600_v12 = vld [vmem:[%s4959_s26 + $0x5ac] ss:$16 sps:$4 sm:$0xff]  }
  0x56   :  { %v3538_v36 = vld [vmem:[%s4959_s26 + $0x468] ss:$16 sps:$4 sm:$0xff]  }
  0x57   :  { %1332 = vmatpush1.bf16.msra.mxu0 %v3427_v19  ;;  %v3519_v19 = vld [vmem:[%s4959_s26 + $0x424] ss:$16 sps:$4 sm:$0xff]  }
  0x58   :  { %1494 = vmatpush1.bf16.msra.mxu1 %v3430_v20  ;;  %1333 = vmatprep.subr.bf16.mxu0 %v3435_v21  ;;  %v75_v20 = vld [vmem:[%s4960_s28 + $0x28] sm:$0xff] }
  0x59   :  { %1495 = vmatprep.subr.bf16.mxu1 %v3438_v22  ;;  %v3522_v21 = vld [vmem:[%s4959_s26 + $0x40c] ss:$16 sps:$4 sm:$0xff]   ;;  %v279_v22 = vpack.c.bf16 %v75_v20, %v75_v20 }
  0x5b   :  { %1334 = vmatpush1.bf16.msra.mxu0 %v3433_v23  ;;  %v3517_v23 = vld [vmem:[%s4959_s26 + $0x420] ss:$16 sps:$4 sm:$0xff]  }
  0x5c   :  { %1496 = vmatpush1.bf16.msra.mxu1 %v3436_v24  ;;  %1335 = vmatprep.subr.bf16.mxu0 %v3441_v25  ;;  %v3520_v24 = vld [vmem:[%s4959_s26 + $0x408] ss:$16 sps:$4 sm:$0xff]   ;;  %v3525_v25 = vld [vmem:[%s4959_s26 + $0x444] ss:$16 sps:$4 sm:$0xff]  }
  0x5d   :  { %1497 = vmatprep.subr.bf16.mxu1 %v3444_v26  ;;  %v3528_v26 = vld [vmem:[%s4959_s26 + $0x42c] ss:$16 sps:$4 sm:$0xff]  }
  0x5f   :  { %1336 = vmatpush1.bf16.msra.mxu0 %v3439_v27  ;;  %v3523_v27 = vld [vmem:[%s4959_s26 + $0x440] ss:$16 sps:$4 sm:$0xff]  }
  0x60   :  { %1498 = vmatpush1.bf16.msra.mxu1 %v3442_v28  ;;  %1337 = vmatprep.subr.bf16.mxu0 %v3447_v29  ;;  %v3526_v28 = vld [vmem:[%s4959_s26 + $0x428] ss:$16 sps:$4 sm:$0xff]   ;;  %v3531_v29 = vld [vmem:[%s4959_s26 + $0x464] ss:$16 sps:$4 sm:$0xff]  }
  0x61   :  { %1499 = vmatprep.subr.bf16.mxu1 %v3450_v30  ;;  %v3534_v30 = vld [vmem:[%s4959_s26 + $0x44c] ss:$16 sps:$4 sm:$0xff]  }
  0x63   :  { %1338 = vmatpush1.bf16.msra.mxu0 %v3445_v31  ;;  %v3529_v31 = vld [vmem:[%s4959_s26 + $0x460] ss:$16 sps:$4 sm:$0xff]  }
  0x64   :  { %1500 = vmatpush1.bf16.msra.mxu1 %v3448_v32  ;;  %1339 = vmatprep.subr.bf16.mxu0 %v3453_v33  ;;  %v3532_v32 = vld [vmem:[%s4959_s26 + $0x448] ss:$16 sps:$4 sm:$0xff]   ;;  %v3537_v33 = vld [vmem:[%s4959_s26 + $0x484] ss:$16 sps:$4 sm:$0xff]  }
  0x65   :  { %1501 = vmatprep.subr.bf16.mxu1 %v3456_v34  ;;  %v3540_v34 = vld [vmem:[%s4959_s26 + $0x46c] ss:$16 sps:$4 sm:$0xff]  }
  0x67   :  { %1340 = vmatpush1.bf16.msra.mxu0 %v3451_v37  ;;  %v3543_v37 = vld [vmem:[%s4959_s26 + $0x4a4] ss:$16 sps:$4 sm:$0xff]  }
  0x68   :  { %1502 = vmatpush1.bf16.msra.mxu1 %v3454_v38  ;;  %1341 = vmatprep.subr.bf16.mxu0 %v3459_v39  ;;  %v3546_v38 = vld [vmem:[%s4959_s26 + $0x48c] ss:$16 sps:$4 sm:$0xff]   ;;  %v3541_v39 = vld [vmem:[%s4959_s26 + $0x4a0] ss:$16 sps:$4 sm:$0xff]  }
  0x69   :  { %1503 = vmatprep.subr.bf16.mxu1 %v3462_v40  ;;  %v3544_v40 = vld [vmem:[%s4959_s26 + $0x488] ss:$16 sps:$4 sm:$0xff]  }
  0x6b   :  { %1342 = vmatpush1.bf16.msra.mxu0 %v3457_v41  ;;  %v3549_v41 = vld [vmem:[%s4959_s26 + $0x4c4] ss:$16 sps:$4 sm:$0xff]  }
  0x6c   :  { %1504 = vmatpush1.bf16.msra.mxu1 %v3460_v42  ;;  %1343 = vmatprep.subr.bf16.mxu0 %v3465_v43  ;;  %v3552_v42 = vld [vmem:[%s4959_s26 + $0x4ac] ss:$16 sps:$4 sm:$0xff]   ;;  %v3547_v43 = vld [vmem:[%s4959_s26 + $0x4c0] ss:$16 sps:$4 sm:$0xff]  }
  0x6d   :  { %1505 = vmatprep.subr.bf16.mxu1 %v3468_v44  ;;  %v3550_v44 = vld [vmem:[%s4959_s26 + $0x4a8] ss:$16 sps:$4 sm:$0xff]  }
  0x6f   :  { %1344 = vmatpush1.bf16.msra.mxu0 %v3463_v45  ;;  %v3555_v45 = vld [vmem:[%s4959_s26 + $0x4e4] ss:$16 sps:$4 sm:$0xff]  }
  0x70   :  { %1506 = vmatpush1.bf16.msra.mxu1 %v3466_v46  ;;  %1345 = vmatprep.subr.bf16.mxu0 %v3471_v47  ;;  %v3558_v46 = vld [vmem:[%s4959_s26 + $0x4cc] ss:$16 sps:$4 sm:$0xff]   ;;  %v3553_v47 = vld [vmem:[%s4959_s26 + $0x4e0] ss:$16 sps:$4 sm:$0xff]  }
  0x71   :  { %1507 = vmatprep.subr.bf16.mxu1 %v3474_v48  ;;  %v3556_v48 = vld [vmem:[%s4959_s26 + $0x4c8] ss:$16 sps:$4 sm:$0xff]  }
  0x73   :  { %1346 = vmatpush1.bf16.msra.mxu0 %v3469_v49  ;;  %v3561_v49 = vld [vmem:[%s4959_s26 + $0x504] ss:$16 sps:$4 sm:$0xff]  }
  0x74   :  { %1508 = vmatpush1.bf16.msra.mxu1 %v3472_v50  ;;  %1347 = vmatprep.subr.bf16.mxu0 %v3477_v51  ;;  %v3564_v50 = vld [vmem:[%s4959_s26 + $0x4ec] ss:$16 sps:$4 sm:$0xff]   ;;  %v3559_v51 = vld [vmem:[%s4959_s26 + $0x500] ss:$16 sps:$4 sm:$0xff]  }
  0x75   :  { %1509 = vmatprep.subr.bf16.mxu1 %v3480_v52  ;;  %v3562_v52 = vld [vmem:[%s4959_s26 + $0x4e8] ss:$16 sps:$4 sm:$0xff]  }
  0x77   :  { %1348 = vmatpush1.bf16.msra.mxu0 %v3475_v53  ;;  %v3567_v53 = vld [vmem:[%s4959_s26 + $0x524] ss:$16 sps:$4 sm:$0xff]  }
  0x78   :  { %1510 = vmatpush1.bf16.msra.mxu1 %v3478_v54  ;;  %1349 = vmatprep.subr.bf16.mxu0 %v3483_v55  ;;  %v3570_v54 = vld [vmem:[%s4959_s26 + $0x50c] ss:$16 sps:$4 sm:$0xff]   ;;  %v3565_v55 = vld [vmem:[%s4959_s26 + $0x520] ss:$16 sps:$4 sm:$0xff]  }
  0x79   :  { %1511 = vmatprep.subr.bf16.mxu1 %v3486_v56  ;;  %v3568_v56 = vld [vmem:[%s4959_s26 + $0x508] ss:$16 sps:$4 sm:$0xff]  }
  0x7b   :  { %1350 = vmatpush1.bf16.msra.mxu0 %v3481_v57  ;;  %v3573_v57 = vld [vmem:[%s4959_s26 + $0x544] ss:$16 sps:$4 sm:$0xff]  }
  0x7c   :  { %1512 = vmatpush1.bf16.msra.mxu1 %v3484_v58  ;;  %1351 = vmatprep.subr.bf16.mxu0 %v3489_v59  ;;  %v3576_v58 = vld [vmem:[%s4959_s26 + $0x52c] ss:$16 sps:$4 sm:$0xff]   ;;  %v3571_v59 = vld [vmem:[%s4959_s26 + $0x540] ss:$16 sps:$4 sm:$0xff]  }
  0x7d   :  { %1513 = vmatprep.subr.bf16.mxu1 %v3492_v60  ;;  %v3574_v60 = vld [vmem:[%s4959_s26 + $0x528] ss:$16 sps:$4 sm:$0xff]  }
  0x7f   :  { %1352 = vmatpush1.bf16.msra.mxu0 %v3487_v61  ;;  %v3579_v61 = vld [vmem:[%s4959_s26 + $0x564] ss:$16 sps:$4 sm:$0xff]  }
  0x80   :  { %1514 = vmatpush1.bf16.msra.mxu1 %v3490_v62  ;;  %1353 = vmatprep.subr.bf16.mxu0 %v3495_v63  ;;  %v3582_v62 = vld [vmem:[%s4959_s26 + $0x54c] ss:$16 sps:$4 sm:$0xff]   ;;  %v3577_v63 = vld [vmem:[%s4959_s26 + $0x560] ss:$16 sps:$4 sm:$0xff]  }
  0x81   :  { %1515 = vmatprep.subr.bf16.mxu1 %v3498_v0  ;;  %v3580_v0 = vld [vmem:[%s4959_s26 + $0x548] ss:$16 sps:$4 sm:$0xff]  }
  0x83   :  { %1354 = vmatpush1.bf16.msra.mxu0 %v3493_v1  ;;  %v3585_v1 = vld [vmem:[%s4959_s26 + $0x584] ss:$16 sps:$4 sm:$0xff]  }
  0x84   :  { %1516 = vmatpush1.bf16.msra.mxu1 %v3496_v3  ;;  %1355 = vmatprep.subr.bf16.mxu0 %v3501_v4  ;;  %v3588_v3 = vld [vmem:[%s4959_s26 + $0x56c] ss:$16 sps:$4 sm:$0xff]   ;;  %v3583_v4 = vld [vmem:[%s4959_s26 + $0x580] ss:$16 sps:$4 sm:$0xff]  }
  0x85   :  { %1517 = vmatprep.subr.bf16.mxu1 %v3504_v5  ;;  %v3586_v5 = vld [vmem:[%s4959_s26 + $0x568] ss:$16 sps:$4 sm:$0xff]  }
  0x87   :  { %1356 = vmatpush1.bf16.msra.mxu0 %v3499_v6  ;;  %v3591_v6 = vld [vmem:[%s4959_s26 + $0x5a4] ss:$16 sps:$4 sm:$0xff]  }
  0x88   :  { %1518 = vmatpush1.bf16.msra.mxu1 %v3502_v7  ;;  %1357 = vmatprep.subr.bf16.mxu0 %v3507_v8  ;;  %v3594_v7 = vld [vmem:[%s4959_s26 + $0x58c] ss:$16 sps:$4 sm:$0xff]   ;;  %v3589_v8 = vld [vmem:[%s4959_s26 + $0x5a0] ss:$16 sps:$4 sm:$0xff]  }
  0x89   :  { %1519 = vmatprep.subr.bf16.mxu1 %v3510_v9  ;;  %v3592_v9 = vld [vmem:[%s4959_s26 + $0x588] ss:$16 sps:$4 sm:$0xff]  }
  0x8b   :  { %1358 = vmatpush1.bf16.msra.mxu0 %v3505_v11  ;;  %v3597_v11 = vld [vmem:[%s4959_s26 + $0x5c4] ss:$16 sps:$4 sm:$0xff]  }
  0x8c   :  { %1520 = vmatpush1.bf16.msra.mxu1 %v3508_v13  ;;  %1368 = vmatprep.subr.bf16.mxu0 %v3513_v14  ;;  %v3595_v13 = vld [vmem:[%s4959_s26 + $0x5c0] ss:$16 sps:$4 sm:$0xff]   ;;  %v3598_v14 = vld [vmem:[%s4959_s26 + $0x5a8] ss:$16 sps:$4 sm:$0xff]  }
  0x8d   :  { %1521 = vmatprep.subr.bf16.mxu1 %v3516_v15  ;;  %v3603_v15 = vld [vmem:[%s4959_s26 + $0x5e4] ss:$16 sps:$4 sm:$0xff]  }
  0x8e   :  { %1360 = vmatmul.mubr.bf16.vlgmr.msra.gmra.mrb[0].mxu0 %v276_v16 }
  0x8f   :  { %1369 = vmatpush1.bf16.msra.mxu0 %v3511_v17  ;;  %1400 = vmatprep.mubr.bf16.mxu0 %v279_v22  ;;  %v3601_v17 = vld [vmem:[%s4959_s26 + $0x5e0] ss:$16 sps:$4 sm:$0xff]  }
  0x90   :  { %1522 = vmatpush1.bf16.msra.mxu1 %v3514_v18  ;;  %1370 = vmatprep.subr.bf16.mxu0 %v3519_v19  ;;  %v74_v18 = vld [vmem:[%s4960_s28 + $0x20] sm:$0xff] }
  0x91   :  { %1532 = vmatprep.subr.bf16.mxu1 %v3522_v21 }
  0x93   :  { %1371 = vmatpush1.bf16.msra.mxu0 %v3517_v23  ;;  %1524 = vmatmul.mubr.bf16.vlgmr.msra.gmra.mrb[4].mxu1 %v276_v16  ;;  %v3606_v16 = vld [vmem:[%s4959_s26 + $0x5cc] ss:$16 sps:$4 sm:$0xff]  }
  0x94   :  { %1533 = vmatpush1.bf16.msra.mxu1 %v3520_v24  ;;  %1372 = vmatprep.subr.bf16.mxu0 %v3525_v25 }
  0x95   :  { %1534 = vmatprep.subr.bf16.mxu1 %v3528_v26  ;;  %1564 = vmatprep.mubr.bf16.mxu1 %v279_v22 }
  0x97   :  { %1373 = vmatpush1.bf16.msra.mxu0 %v3523_v27 }
  0x98   :  { %1535 = vmatpush1.bf16.msra.mxu1 %v3526_v28  ;;  %1374 = vmatprep.subr.bf16.mxu0 %v3531_v29 }
  0x99   :  { %1536 = vmatprep.subr.bf16.mxu1 %v3534_v30 }
  0x9b   :  { %1375 = vmatpush1.bf16.msra.mxu0 %v3529_v31 }
  0x9c   :  { %1537 = vmatpush1.bf16.msra.mxu1 %v3532_v32  ;;  %1376 = vmatprep.subr.bf16.mxu0 %v3537_v33 }
  0x9d   :  { %1538 = vmatprep.subr.bf16.mxu1 %v3540_v34 }
  0x9f   :  { %1377 = vmatpush1.bf16.msra.mxu0 %v3535_v35 }
  0xa0   :  { %1539 = vmatpush1.bf16.msra.mxu1 %v3538_v36  ;;  %1378 = vmatprep.subr.bf16.mxu0 %v3543_v37 }
  0xa1   :  { %1540 = vmatprep.subr.bf16.mxu1 %v3546_v38 }
  0xa3   :  { %1379 = vmatpush1.bf16.msra.mxu0 %v3541_v39 }
  0xa4   :  { %1541 = vmatpush1.bf16.msra.mxu1 %v3544_v40  ;;  %1380 = vmatprep.subr.bf16.mxu0 %v3549_v41 }
  0xa5   :  { %1542 = vmatprep.subr.bf16.mxu1 %v3552_v42 }
  0xa7   :  { %1381 = vmatpush1.bf16.msra.mxu0 %v3547_v43 }
  0xa8   :  { %1543 = vmatpush1.bf16.msra.mxu1 %v3550_v44  ;;  %1382 = vmatprep.subr.bf16.mxu0 %v3555_v45 }
  0xa9   :  { %1544 = vmatprep.subr.bf16.mxu1 %v3558_v46 }
  0xab   :  { %1383 = vmatpush1.bf16.msra.mxu0 %v3553_v47 }
  0xac   :  { %1545 = vmatpush1.bf16.msra.mxu1 %v3556_v48  ;;  %1384 = vmatprep.subr.bf16.mxu0 %v3561_v49 }
  0xad   :  { %1546 = vmatprep.subr.bf16.mxu1 %v3564_v50 }
  0xaf   :  { %1385 = vmatpush1.bf16.msra.mxu0 %v3559_v51 }
  0xb0   :  { %1547 = vmatpush1.bf16.msra.mxu1 %v3562_v52  ;;  %1386 = vmatprep.subr.bf16.mxu0 %v3567_v53 }
  0xb1   :  { %1548 = vmatprep.subr.bf16.mxu1 %v3570_v54 }
  0xb3   :  { %1387 = vmatpush1.bf16.msra.mxu0 %v3565_v55 }
  0xb4   :  { %1549 = vmatpush1.bf16.msra.mxu1 %v3568_v56  ;;  %1388 = vmatprep.subr.bf16.mxu0 %v3573_v57 }
  0xb5   :  { %1550 = vmatprep.subr.bf16.mxu1 %v3576_v58 }
  0xb7   :  { %1389 = vmatpush1.bf16.msra.mxu0 %v3571_v59 }
  0xb8   :  { %1551 = vmatpush1.bf16.msra.mxu1 %v3574_v60  ;;  %1390 = vmatprep.subr.bf16.mxu0 %v3579_v61 }
  0xb9   :  { %1552 = vmatprep.subr.bf16.mxu1 %v3582_v62 }
  0xbb   :  { %1391 = vmatpush1.bf16.msra.mxu0 %v3577_v63 }
  0xbc   :  { %1553 = vmatpush1.bf16.msra.mxu1 %v3580_v0  ;;  %1392 = vmatprep.subr.bf16.mxu0 %v3585_v1 }
  0xbd   :  { %1554 = vmatprep.subr.bf16.mxu1 %v3588_v3 }
  0xbf   :  { %1393 = vmatpush1.bf16.msra.mxu0 %v3583_v4 }
  0xc0   :  { %1555 = vmatpush1.bf16.msra.mxu1 %v3586_v5  ;;  %1394 = vmatprep.subr.bf16.mxu0 %v3591_v6 }
  0xc1   :  { %1556 = vmatprep.subr.bf16.mxu1 %v3594_v7 }
  0xc3   :  { %1395 = vmatpush1.bf16.msra.mxu0 %v3589_v8 }
  0xc4   :  { %1557 = vmatpush1.bf16.msra.mxu1 %v3592_v9  ;;  %1396 = vmatprep.subr.bf16.mxu0 %v3597_v11 }
  0xc5   :  { %1558 = vmatprep.subr.bf16.mxu1 %v3600_v12 }
  0xc7   :  { %1397 = vmatpush1.bf16.msra.mxu0 %v3595_v13 }
  0xc8   :  { %26 = vsyncpa [#allocation3], 0  ;;  %1559 = vmatpush1.bf16.msra.mxu1 %v3598_v14  ;;  %1398 = vmatprep.subr.bf16.mxu0 %v3603_v15  ;;  %v3604_v19 = vld [vmem:[%s4959_s26 + $0x5c8] ss:$16 sps:$4 sm:$0xff]   ;;  %s4961_s22 = sld [smem:[#allocation8_spill]]  ;;  %v278_v22 = vpack.c.bf16 %v74_v18, %v74_v18  ;;  %s4962_s25 = sld [smem:[#allocation10_spill]]  ;;  %v282_v9 = vlaneseq }
  0xc9   :  { %1560 = vmatprep.subr.bf16.mxu1 %v3606_v16  ;;  %v3609_v21 = vld [vmem:[%s4959_s26 + $0x5ec] ss:$16 sps:$4 sm:$0xff]   ;;  %v3607_v24 = vld [vmem:[%s4959_s26 + $0x5e8] ss:$16 sps:$4 sm:$0xff]   ;;  %s4963_s28 = sld [smem:[#allocation7_spill]]  ;;  %s4964_s4 = sld [smem:[#allocation9_spill]] }
  0xca   :  { %v3612_v26 = vld [vmem:[%s4959_s26 + $0x60c] ss:$16 sps:$4 sm:$0xff]   ;;  %v3610_v28 = vld [vmem:[%s4959_s26 + $0x608] ss:$16 sps:$4 sm:$0xff]   ;;  %v4645_v11 = vshrl.u32 %v282_v9, 7  ;;  %vm3777_vm1 = vmmov 0  }
  0xcb   :  { %1399 = vmatpush1.bf16.msra.mxu0 %v3601_v17  ;;  %vm2433_vm2 = vcmask 523264   ;;  %vm2502_vm3 = vcmask 261120   ;;  %vm2571_vm4 = vcmask 1043456   ;;  %vm2567_vm5 = vcmask 195584  }
  0xcc   :  { %1561 = vmatpush1.bf16.msra.mxu1 %v3604_v19  ;;  %v284_v12 = vsub.s32 0, %v4645_v11  ;;  %v288_v14 = vsub.s32 1, %v4645_v11  ;;  %vm2816_vm6 = vcmask 80896  }
  0xcd   :  { %1562 = vmatprep.subr.bf16.mxu1 %v3609_v21 }
  0xce   :  { %v3615_v20 = vld [vmem:[%s4961_s22 + $0x4] ss:$8 sps:$4 sm:$0xff]   ;;  %v3613_v23 = vld [vmem:[%s4961_s22] ss:$8 sps:$4 sm:$0xff]   ;;  %v3618_v25 = vld [vmem:[%s4961_s22 + $0x14] ss:$8 sps:$4 sm:$0xff]   ;;  %1401 = vmatmul.mubr.bf16.vlgmr.msra.gmra.mrb[0].mxu0 %v278_v22 }
  0xcf   :  { %2018 = vmatprep.subr.bf16.mxu0 %v3615_v20  ;;  %v3616_v27 = vld [vmem:[%s4961_s22 + $0x10] ss:$8 sps:$4 sm:$0xff]   ;;  %v3621_v29 = vld [vmem:[%s4961_s22 + $0x24] ss:$8 sps:$4 sm:$0xff]   ;;  %v3619_v30 = vld [vmem:[%s4961_s22 + $0x20] ss:$8 sps:$4 sm:$0xff]  }
  0xd0   :  { %2019 = vmatpush1.bf16.msra.mxu0 %v3613_v23  ;;  %1563 = vmatpush1.bf16.msra.mxu1 %v3607_v24  ;;  %v3624_v31 = vld [vmem:[%s4961_s22 + $0x34] ss:$8 sps:$4 sm:$0xff]   ;;  %v3622_v32 = vld [vmem:[%s4961_s22 + $0x30] ss:$8 sps:$4 sm:$0xff]   ;;  %v3627_v33 = vld [vmem:[%s4961_s22 + $0x44] ss:$8 sps:$4 sm:$0xff]  }
  0xd1   :  { %2020 = vmatprep.subr.bf16.mxu0 %v3618_v25  ;;  %1573 = vmatprep.subr.bf16.mxu1 %v3612_v26  ;;  %v3630_v34 = vld [vmem:[%s4961_s22 + $0x54] ss:$8 sps:$4 sm:$0xff]   ;;  %v3628_v35 = vld [vmem:[%s4961_s22 + $0x50] ss:$8 sps:$4 sm:$0xff]   ;;  %v3633_v36 = vld [vmem:[%s4961_s22 + $0x64] ss:$8 sps:$4 sm:$0xff]  }
  0xd2   :  { %v3631_v37 = vld [vmem:[%s4961_s22 + $0x60] ss:$8 sps:$4 sm:$0xff]   ;;  %v3634_v40 = vld [vmem:[%s4961_s22 + $0x70] ss:$8 sps:$4 sm:$0xff]   ;;  %v3639_v42 = vld [vmem:[%s4961_s22 + $0x84] ss:$8 sps:$4 sm:$0xff]  }
  0xd3   :  { %1565 = vmatmul.mubr.bf16.vlgmr.msra.gmra.mrb[4].mxu1 %v278_v22  ;;  %v3637_v44 = vld [vmem:[%s4961_s22 + $0x80] ss:$8 sps:$4 sm:$0xff]   ;;  %v3642_v45 = vld [vmem:[%s4961_s22 + $0x94] ss:$8 sps:$4 sm:$0xff]   ;;  %v3640_v46 = vld [vmem:[%s4961_s22 + $0x90] ss:$8 sps:$4 sm:$0xff]  }
  0xd4   :  { %2021 = vmatpush1.bf16.msra.mxu0 %v3616_v27  ;;  %1574 = vmatpush1.bf16.msra.mxu1 %v3610_v28  ;;  %v3645_v47 = vld [vmem:[%s4961_s22 + $0xa4] ss:$8 sps:$4 sm:$0xff]   ;;  %v3643_v48 = vld [vmem:[%s4961_s22 + $0xa0] ss:$8 sps:$4 sm:$0xff]   ;;  %v3648_v49 = vld [vmem:[%s4961_s22 + $0xb4] ss:$8 sps:$4 sm:$0xff]  }
  0xd5   :  { %1605 = vmatprep.mubr.bf16.mxu1 %v3775_v2  ;;  %2022 = vmatprep.subr.bf16.mxu0 %v3621_v29  ;;  %v3625_v2 = vld [vmem:[%s4961_s22 + $0x40] ss:$8 sps:$4 sm:$0xff]   ;;  %v3646_v50 = vld [vmem:[%s4961_s22 + $0xb0] ss:$8 sps:$4 sm:$0xff]   ;;  %v3651_v51 = vld [vmem:[%s4961_s22 + $0xc4] ss:$8 sps:$4 sm:$0xff]  }
  0xd6   :  { %v3649_v52 = vld [vmem:[%s4961_s22 + $0xc0] ss:$8 sps:$4 sm:$0xff]   ;;  %v3654_v53 = vld [vmem:[%s4961_s22 + $0xd4] ss:$8 sps:$4 sm:$0xff]   ;;  %v3652_v54 = vld [vmem:[%s4961_s22 + $0xd0] ss:$8 sps:$4 sm:$0xff]  }
  0xd7   :  { %v3657_v55 = vld [vmem:[%s4961_s22 + $0xe4] ss:$8 sps:$4 sm:$0xff]   ;;  %v3655_v56 = vld [vmem:[%s4961_s22 + $0xe0] ss:$8 sps:$4 sm:$0xff]   ;;  %v3660_v57 = vld [vmem:[%s4961_s22 + $0xf4] ss:$8 sps:$4 sm:$0xff]  }
  0xd8   :  { %2023 = vmatpush1.bf16.msra.mxu0 %v3619_v30  ;;  %v3658_v58 = vld [vmem:[%s4961_s22 + $0xf0] ss:$8 sps:$4 sm:$0xff]   ;;  %v3663_v59 = vld [vmem:[%s4961_s22 + $0x104] ss:$8 sps:$4 sm:$0xff]   ;;  %v4651_v13 = vld [vmem:[%s4963_s28] sm:$0xf] }
  0xd9   :  { %2024 = vmatprep.subr.bf16.mxu0 %v3624_v31  ;;  %v3709_v60 = vld [vmem:[%s4962_s25 + $0x40] sm:$0xff]   ;;  %v3711_v62 = vld [vmem:[%s4962_s25 + $0x48] sm:$0xff]   ;;  %v3713_v0 = vld [vmem:[%s4962_s25 + $0x50] sm:$0xff]   ;;  %v285_v15 = vrot.slane %v4651_v13, %v284_v12  ;;  %v289_v16 = vrot.slane %v4651_v13, %v288_v14  ;;  %v296_v31 = vsub.s32 3, %v4645_v11 }
  0xda   :  { %v3710_v61 = vld [vmem:[%s4962_s25] sm:$0xff]   ;;  %3160 = vmatprep.subr.bf16.mxu1 %v3709_v60  ;;  %v3712_v63 = vld [vmem:[%s4962_s25 + $0x8] sm:$0xff]   ;;  %v3714_v1 = vld [vmem:[%s4962_s25 + $0x10] sm:$0xff]  }
  0xdb   :  { %v3715_v3 = vld [vmem:[%s4962_s25 + $0x58] sm:$0xff]   ;;  %v3717_v5 = vld [vmem:[%s4962_s25 + $0x60] sm:$0xff]   ;;  %v3719_v7 = vld [vmem:[%s4962_s25 + $0x68] sm:$0xff]  }
  0xdc   :  { %2025 = vmatpush1.bf16.msra.mxu0 %v3622_v32  ;;  %v3716_v4 = vld [vmem:[%s4962_s25 + $0x18] sm:$0xff]   ;;  %v3718_v6 = vld [vmem:[%s4962_s25 + $0x20] sm:$0xff]   ;;  %v3720_v8 = vld [vmem:[%s4962_s25 + $0x28] sm:$0xff]  }
  0xdd   :  { %2026 = vmatprep.subr.bf16.mxu0 %v3627_v33  ;;  %v3661_v28 = vld [vmem:[%s4961_s22 + $0x100] ss:$8 sps:$4 sm:$0xff]   ;;  %v3666_v30 = vld [vmem:[%s4961_s22 + $0x114] ss:$8 sps:$4 sm:$0xff]   ;;  %v3664_v32 = vld [vmem:[%s4961_s22 + $0x110] ss:$8 sps:$4 sm:$0xff]  }
  0xde   :  { %v3669_v33 = vld [vmem:[%s4961_s22 + $0x124] ss:$8 sps:$4 sm:$0xff]   ;;  %v3697_v60 = vld [vmem:[%s4961_s22 + $0x1c0] ss:$8 sps:$4 sm:$0xff]   ;;  %v3721_v9 = vld [vmem:[%s4962_s25 + $0x70] sm:$0xff]  }
  0xdf   :  { %3043 = vmatmul.mubr.msk.bf16.vlgmr.msra.gmra.mrb[4].mxu1 %vm1282_vm0, %v3917_v10  ;;  %v3636_v10 = vld [vmem:[%s4961_s22 + $0x74] ss:$8 sps:$4 sm:$0xff]  }
  0xe0   :  { %2027 = vmatpush1.bf16.msra.mxu0 %v3625_v2  ;;  %3161 = vmatpush3.bf16.msra.mxu1 %v3710_v61  ;;  %v297_v2 = vrot.slane %v4651_v13, %v296_v31  ;;  %v292_v61 = vsub.s32 2, %v4645_v11  ;;  %v3726_v11 = vld [vmem:[%s4934_s7 + $0x8] sm:$0xff]  }
  0xe1   :  { %2028 = vmatprep.subr.bf16.mxu0 %v3630_v34  ;;  %3162 = vmatprep.subr.bf16.mxu1 %v3711_v62  ;;  %v3667_v34 = vld [vmem:[%s4961_s22 + $0x120] ss:$8 sps:$4 sm:$0xff]   ;;  %v3702_v62 = vld [vmem:[%s4961_s22 + $0x1d4] ss:$8 sps:$4 sm:$0xff]  }
  0xe4   :  { %2029 = vmatpush1.bf16.msra.mxu0 %v3628_v35  ;;  %3163 = vmatpush3.bf16.msra.mxu1 %v3712_v63  ;;  %v3700_v63 = vld [vmem:[%s4961_s22 + $0x1d0] ss:$8 sps:$4 sm:$0xff]  }
  0xe5   :  { %2030 = vmatprep.subr.bf16.mxu0 %v3633_v36  ;;  %3164 = vmatprep.subr.bf16.mxu1 %v3713_v0  ;;  %v3672_v36 = vld [vmem:[%s4961_s22 + $0x134] ss:$8 sps:$4 sm:$0xff]   ;;  %v293_v0 = vrot.slane %v4651_v13, %v292_v61 }
  0xe6   :  { %v4551_v38 = vpop.f32.mrb[0].mxu1  ;;  %v3722_v13 = vld [vmem:[%s4962_s25 + $0x30] sm:$0xff]  }
  0xe7   :  { %v4553_v39 = vpop.f32.mrb[1].mxu1 }
  0xe8   :  { %2031 = vmatpush1.bf16.msra.mxu0 %v3631_v37  ;;  %v1447_v41 = vpop.f32.mrb[2].mxu1  ;;  %3165 = vmatpush3.bf16.msra.mxu1 %v3714_v1  ;;  %v3705_v1 = vld [vmem:[%s4961_s22 + $0x1e4] ss:$8 sps:$4 sm:$0xff]  }
  0xe9   :  { %2032 = vmatprep.subr.bf16.mxu0 %v3636_v10  ;;  %v1448_v43 = vpop.f32.mrb[3].mxu1  ;;  %3166 = vmatprep.subr.bf16.mxu1 %v3715_v3  ;;  %v3703_v3 = vld [vmem:[%s4961_s22 + $0x1e0] ss:$8 sps:$4 sm:$0xff]  }
  0xec   :  { %2033 = vmatpush1.bf16.msra.mxu0 %v3634_v40  ;;  %3167 = vmatpush3.bf16.msra.mxu1 %v3716_v4  ;;  %v3670_v40 = vld [vmem:[%s4961_s22 + $0x130] ss:$8 sps:$4 sm:$0xff]  }
  0xed   :  { %2034 = vmatprep.subr.bf16.mxu0 %v3639_v42  ;;  %3168 = vmatprep.subr.bf16.mxu1 %v3717_v5  ;;  %v3675_v42 = vld [vmem:[%s4961_s22 + $0x144] ss:$8 sps:$4 sm:$0xff]   ;;  %v3708_v5 = vld [vmem:[%s4961_s22 + $0x1f4] ss:$8 sps:$4 sm:$0xff]  }
  0xf0   :  { %2035 = vmatpush1.bf16.msra.mxu0 %v3637_v44  ;;  %3169 = vmatpush3.bf16.msra.mxu1 %v3718_v6  ;;  %v3673_v44 = vld [vmem:[%s4961_s22 + $0x140] ss:$8 sps:$4 sm:$0xff]   ;;  %v3706_v6 = vld [vmem:[%s4961_s22 + $0x1f0] ss:$8 sps:$4 sm:$0xff]  }
  0xf1   :  { %2036 = vmatprep.subr.bf16.mxu0 %v3642_v45  ;;  %3170 = vmatprep.subr.bf16.mxu1 %v3719_v7  ;;  %v3678_v45 = vld [vmem:[%s4961_s22 + $0x154] ss:$8 sps:$4 sm:$0xff]  }
  0xf4   :  { %2037 = vmatpush1.bf16.msra.mxu0 %v3640_v46  ;;  %3171 = vmatpush3.bf16.msra.mxu1 %v3720_v8  ;;  %v3676_v46 = vld [vmem:[%s4961_s22 + $0x150] ss:$8 sps:$4 sm:$0xff]  }
  0xf5   :  { %2038 = vmatprep.subr.bf16.mxu0 %v3645_v47  ;;  %v3681_v47 = vld [vmem:[%s4961_s22 + $0x164] ss:$8 sps:$4 sm:$0xff]   ;;  %3172 = vmatprep.subr.bf16.mxu1 %v3721_v9 }
  0xf8   :  { %2039 = vmatpush1.bf16.msra.mxu0 %v3643_v48  ;;  %v3679_v48 = vld [vmem:[%s4961_s22 + $0x160] ss:$8 sps:$4 sm:$0xff]   ;;  %3173 = vmatpush3.bf16.msra.mxu1 %v3722_v13 }
  0xf9   :  { %2040 = vmatprep.subr.bf16.mxu0 %v3648_v49  ;;  %v3684_v49 = vld [vmem:[%s4961_s22 + $0x174] ss:$8 sps:$4 sm:$0xff]  }
  0xfc   :  { %2041 = vmatpush1.bf16.msra.mxu0 %v3646_v50  ;;  %v3682_v50 = vld [vmem:[%s4961_s22 + $0x170] ss:$8 sps:$4 sm:$0xff]  }
  0xfd   :  { %2042 = vmatprep.subr.bf16.mxu0 %v3651_v51  ;;  %v3687_v51 = vld [vmem:[%s4961_s22 + $0x184] ss:$8 sps:$4 sm:$0xff]  }
 0x100   :  { %2043 = vmatpush1.bf16.msra.mxu0 %v3649_v52  ;;  %v3685_v52 = vld [vmem:[%s4961_s22 + $0x180] ss:$8 sps:$4 sm:$0xff]  }
 0x101   :  { %2044 = vmatprep.subr.bf16.mxu0 %v3654_v53  ;;  %v3690_v53 = vld [vmem:[%s4961_s22 + $0x194] ss:$8 sps:$4 sm:$0xff]  }
 0x104   :  { %2045 = vmatpush1.bf16.msra.mxu0 %v3652_v54  ;;  %v3688_v54 = vld [vmem:[%s4961_s22 + $0x190] ss:$8 sps:$4 sm:$0xff]  }
 0x105   :  { %2046 = vmatprep.subr.bf16.mxu0 %v3657_v55  ;;  %v3693_v55 = vld [vmem:[%s4961_s22 + $0x1a4] ss:$8 sps:$4 sm:$0xff]  }
 0x108   :  { %2047 = vmatpush1.bf16.msra.mxu0 %v3655_v56  ;;  %v3691_v56 = vld [vmem:[%s4961_s22 + $0x1a0] ss:$8 sps:$4 sm:$0xff]  }
 0x109   :  { %2048 = vmatprep.subr.bf16.mxu0 %v3660_v57  ;;  %v3696_v57 = vld [vmem:[%s4961_s22 + $0x1b4] ss:$8 sps:$4 sm:$0xff]  }
 0x10c   :  { %2049 = vmatpush1.bf16.msra.mxu0 %v3658_v58  ;;  %v3694_v58 = vld [vmem:[%s4961_s22 + $0x1b0] ss:$8 sps:$4 sm:$0xff]  }
 0x10d   :  { %2059 = vmatprep.subr.bf16.mxu0 %v3663_v59  ;;  %v3699_v59 = vld [vmem:[%s4961_s22 + $0x1c4] ss:$8 sps:$4 sm:$0xff]  }
 0x1a1   :  { %v1402_v17 = vpop.f32.mrb[0].mxu0 }
 0x1a2   :  { %v3283_v18 = vadd.f32 %v1402_v17, %v285_v15  ;;  %v1404_v19 = vpop.f32.mrb[1].mxu0  ;;  %v3723_v15 = vld [vmem:[%s4962_s25 + $0x78] sm:$0xff]   ;;  %v3776_v17 = vmov 0.0  }
 0x1a3   :  { %v3285_v20 = vadd.f32 %v1404_v19, %v289_v16  ;;  %v1406_v21 = vpop.f32.mrb[2].mxu0  ;;  %v3724_v16 = vld [vmem:[%s4962_s25 + $0x38] sm:$0xff]   ;;  %3174 = vmatprep.subr.bf16.mxu1 %v3723_v15 }
 0x1a4   :  { %v3284_v22 = vadd.f32 %v3283_v18, %v4551_v38  ;;  %v1407_v23 = vpop.f32.mrb[3].mxu0  ;;  %3175 = vmatpush3.bf16.msra.mxu1 %v3724_v16  ;;  %v1682_v18 = vld [vmem:[%s4964_s4] sm:$0x3] }
 0x1a5   :  { %v3286_v24 = vadd.f32 %v3285_v20, %v4553_v39  ;;  %3211 = vmatprep.subr.bf16.mxu1 %v3776_v17  ;;  %v1691_v19 = vrot.slane %v1682_v18, %v284_v12  ;;  %v1695_v20 = vrot.slane %v1682_v18, %v288_v14  ;;  %v3727_v12 = vld [vmem:[%s4934_s7 + $0x10] sm:$0xff]   ;;  %v3728_v14 = vld [vmem:[%s4934_s7 + $0x18] sm:$0xff]   ;;  %v3741_v16 = vld [vmem:[%s4942_s15] sm:$0xff]  }
 0x1a6   :  { %v1614_v25 = vmax.f32 %v3284_v22, 0.0 }
 0x1a7   :  { %v1615_v26 = vmax.f32 %v3286_v24, 0.0 }
 0x1a8   :  { %v1683_v29 = vpack.c.bf16 %v1614_v25, %v1614_v25 }
 0x1a9   :  { %v1684_v27 = vpack.c.bf16 %v1615_v26, %v1615_v26 }
 0x1ab   :  { %2050 = vmatprep.mubr.bf16.mxu0 %v1684_v27 }
 0x1ac   :  { %2051 = vmatmul.mubr.bf16.vlgmr.msra.gmra.mrb[4].mxu0 %v1683_v29 }
 0x1ad   :  { %2060 = vmatpush1.bf16.msra.mxu0 %v3661_v28 }
 0x1ae   :  { %2061 = vmatprep.subr.bf16.mxu0 %v3666_v30  ;;  %v3725_v30 = vld [vmem:[%s4934_s7] sm:$0xff]  }
 0x1b1   :  { %2062 = vmatpush1.bf16.msra.mxu0 %v3664_v32  ;;  %v3729_v32 = vld [vmem:[%s4934_s7 + $0x20] sm:$0xff]  }
 0x1b2   :  { %v1607_v35 = vpop.f32.mrb[4].mxu1  ;;  %2063 = vmatprep.subr.bf16.mxu0 %v3669_v33  ;;  %v3730_v33 = vld [vmem:[%s4934_s7 + $0x28] sm:$0xff]  }
 0x1b3   :  { %v1609_v37 = vpop.f32.mrb[5].mxu1  ;;  %v3287_v4 = vadd.f32 %v1607_v35, %v293_v0  ;;  %v3739_v0 = vld [vmem:[%s4940_s13] sm:$0xff]  }
 0x1b4   :  { %v3288_v10 = vadd.f32 %v1609_v37, %v297_v2  ;;  %v1611_v38 = vpop.f32.mrb[6].mxu1  ;;  %v3731_v2 = vld [vmem:[%s4934_s7 + $0x30] sm:$0xff]  }
 0x1b5   :  { %v1612_v39 = vpop.f32.mrb[7].mxu1  ;;  %2064 = vmatpush1.bf16.msra.mxu0 %v3667_v34  ;;  %v1616_v7 = vmax.f32 %v3287_v4, 0.0  ;;  %v3732_v34 = vld [vmem:[%s4934_s7 + $0x38] sm:$0xff]  }
 0x1b6   :  { %v1617_v41 = vmax.f32 %v3288_v10, 0.0  ;;  %2065 = vmatprep.subr.bf16.mxu0 %v3672_v36  ;;  %v3108_v36 = vld [vmem:[%s4933_s6] ss:$0 sm:$0xff] }
 0x1b7   :  { %v1685_v8 = vpack.c.bf16 %v1616_v7, %v1616_v7 }
 0x1b8   :  { %v1686_v43 = vpack.c.bf16 %v1617_v41, %v1617_v41 }
 0x1b9   :  { %2066 = vmatpush1.bf16.msra.mxu0 %v3670_v40 }
 0x1ba   :  { %2091 = vmatprep.mubr.bf16.mxu0 %v1686_v43  ;;  %2067 = vmatprep.subr.bf16.mxu0 %v3675_v42  ;;  %v3733_v42 = vld [vmem:[%s4936_s9] sm:$0xff]  }
 0x1bd   :  { %2068 = vmatpush1.bf16.msra.mxu0 %v3673_v44  ;;  %v3734_v44 = vld [vmem:[%s4936_s9 + $0x8] sm:$0xff]  }
 0x1be   :  { %2069 = vmatprep.subr.bf16.mxu0 %v3678_v45  ;;  %v3735_v45 = vld [vmem:[%s4936_s9 + $0x10] sm:$0xff]  }
 0x1c1   :  { %2070 = vmatpush1.bf16.msra.mxu0 %v3676_v46  ;;  %v3736_v46 = vld [vmem:[%s4936_s9 + $0x18] sm:$0xff]  }
 0x1c2   :  { %2071 = vmatprep.subr.bf16.mxu0 %v3681_v47  ;;  %v3125_v47 = vld [vmem:[%s4935_s8] ss:$0 sm:$0xff] }
 0x1c5   :  { %2072 = vmatpush1.bf16.msra.mxu0 %v3679_v48 }
 0x1c6   :  { %2073 = vmatprep.subr.bf16.mxu0 %v3684_v49 }
 0x1c9   :  { %2074 = vmatpush1.bf16.msra.mxu0 %v3682_v50 }
 0x1ca   :  { %2075 = vmatprep.subr.bf16.mxu0 %v3687_v51 }
 0x1cd   :  { %2076 = vmatpush1.bf16.msra.mxu0 %v3685_v52 }
 0x1ce   :  { %2077 = vmatprep.subr.bf16.mxu0 %v3690_v53 }
 0x1d1   :  { %2078 = vmatpush1.bf16.msra.mxu0 %v3688_v54  ;;  %v3737_v54 = vld [vmem:[%s4938_s11] sm:$0xff]  }
 0x1d2   :  { %2079 = vmatprep.subr.bf16.mxu0 %v3693_v55 }
 0x1d5   :  { %2080 = vmatpush1.bf16.msra.mxu0 %v3691_v56  ;;  %v3738_v56 = vld [vmem:[%s4938_s11 + $0x8] sm:$0xff]  }
 0x1d6   :  { %2081 = vmatprep.subr.bf16.mxu0 %v3696_v57  ;;  %v3134_v57 = vld [vmem:[%s4937_s10] ss:$0 sm:$0xff] }
 0x1d9   :  { %2082 = vmatpush1.bf16.msra.mxu0 %v3694_v58 }
 0x1da   :  { %2083 = vmatprep.subr.bf16.mxu0 %v3699_v59 }
 0x1dd   :  { %2084 = vmatpush1.bf16.msra.mxu0 %v3697_v60 }
 0x1de   :  { %2085 = vmatprep.subr.bf16.mxu0 %v3702_v62 }
 0x1e1   :  { %2086 = vmatpush1.bf16.msra.mxu0 %v3700_v63 }
 0x1e2   :  { %2087 = vmatprep.subr.bf16.mxu0 %v3705_v1 }
 0x1e5   :  { %2088 = vmatpush1.bf16.msra.mxu0 %v3703_v3  ;;  %v3740_v3 = vld [vmem:[%s4940_s13 + $0x8] ss:$0 sps:$4 sm:$0xff]  }
 0x1e6   :  { %2089 = vmatprep.subr.bf16.mxu0 %v3708_v5  ;;  %v2573_v4 = vsel %vm2571_vm4, %v3740_v3, 0  ;;  %v3140_v5 = vld [vmem:[%s4939_s12] ss:$0 sm:$0xff] }
 0x1e9   :  { %2090 = vmatpush1.bf16.msra.mxu0 %v3706_v6 }
 0x1ec   :  { %2092 = vmatmul.mubr.bf16.vlgmr.msra.gmra.mrb[4].mxu0 %v1685_v8 }
 0x2bf   :  { %v2093_v21 = vpop.f32.mrb[4].mxu0 }
 0x2c0   :  { %v3289_v22 = vadd.f32 %v2093_v21, %v1691_v19  ;;  %v2095_v23 = vpop.f32.mrb[5].mxu0  ;;  %v3742_v19 = vld [vmem:[%s4942_s15 + $0x8] ss:$0 sps:$4 sm:$0xff]   ;;  %v3144_v21 = vld [vmem:[%s4941_s14] ss:$0 sm:$0xff] }
 0x2c1   :  { %v3290_v24 = vadd.f32 %v2095_v23, %v1695_v20  ;;  %v2097_v25 = vpop.f32.mrb[6].mxu0  ;;  %v2640_v20 = vsel %vm2571_vm4, %v3742_v19, 0 }
 0x2c2   :  { %v2100_v26 = vmax.f32 %v3289_v22, 0.0  ;;  %v2098_v27 = vpop.f32.mrb[7].mxu0 }
 0x2c3   :  { %v2101_v28 = vmax.f32 %v3290_v24, 0.0 }
 0x2c4   :  { %v2135_v31 = vpack.c.bf16 %v2100_v26, %v2100_v26 }
 0x2c5   :  { %v2136_v29 = vpack.c.bf16 %v2101_v28, %v2101_v28  ;;  %v3743_v28 = vld [vmem:[%s4944_s17] sm:$0xff]  }
 0x2c7   :  { %2271 = vmatprep.mubr.bf16.mxu1 %v2136_v29 }
 0x2c8   :  { %2272 = vmatmul.mubr.bf16.vlgmr.msra.gmra.mrb[8].mxu1 %v2135_v31 }
 0x2c9   :  { %3212 = vmatpush3.bf16.msra.mxu1 %v3725_v30  ;;  %3227 = vmatprep.mubr.msk.bf16.mxu1 %vm3777_vm1, %v3776_v17  ;;  %v3744_v30 = vld [vmem:[%s4944_s17 + $0x8] ss:$0 sps:$4 sm:$0xff]  }
 0x2ca   :  { %3213 = vmatprep.subr.bf16.mxu1 %v3776_v17  ;;  %v2707_v31 = vsel %vm2571_vm4, %v3744_v30, 0 }
 0x2cd   :  { %3214 = vmatpush3.bf16.msra.mxu1 %v3726_v11  ;;  %v3148_v11 = vld [vmem:[%s4943_s16] ss:$0 sm:$0xff] }
 0x2ce   :  { %3215 = vmatprep.subr.bf16.mxu1 %v3776_v17 }
 0x2d1   :  { %3216 = vmatpush3.bf16.msra.mxu1 %v3727_v12 }
 0x2d2   :  { %3217 = vmatprep.subr.bf16.mxu1 %v3776_v17 }
 0x2d5   :  { %3218 = vmatpush3.bf16.msra.mxu1 %v3728_v14 }
 0x2d6   :  { %3219 = vmatprep.subr.bf16.mxu1 %v3776_v17 }
 0x2d9   :  { %3220 = vmatpush3.bf16.msra.mxu1 %v3729_v32 }
 0x2da   :  { %3221 = vmatprep.subr.bf16.mxu1 %v3776_v17 }
 0x2dd   :  { %3222 = vmatpush3.bf16.msra.mxu1 %v3730_v33 }
 0x2de   :  { %3223 = vmatprep.subr.bf16.mxu1 %v3776_v17 }
 0x2e1   :  { %3224 = vmatpush3.bf16.msra.mxu1 %v3731_v2 }
 0x2e2   :  { %3225 = vmatprep.subr.bf16.mxu1 %v3776_v17 }
 0x2e5   :  { %3226 = vmatpush3.bf16.msra.mxu1 %v3732_v34 }
 0x2e6   :  { %3231 = vmatprep.subr.bf16.mxu1 %v3776_v17 }
 0x39b   :  { %v3176_v35 = vpop.f32.mrb[8].mxu1 }
 0x39c   :  { %v3177_v37 = vpop.f32.mrb[9].mxu1 }
 0x39d   :  { %v3178_v10 = vadd.f32 %v3177_v37, %v3176_v35  ;;  %v3179_v38 = vpop.f32.mrb[10].mxu1  ;;  %v3745_v35 = vld [vmem:[%s4946_s19] sm:$0xff]   ;;  %v3746_v37 = vld [vmem:[%s4946_s19 + $0x8] ss:$0 sps:$4 sm:$0xff]  }
 0x39e   :  { %v3180_v39 = vpop.f32.mrb[11].mxu1  ;;  %v3152_v38 = vld [vmem:[%s4945_s18] ss:$0 sm:$0xff]  ;;  %s3778_s18 = smov [#allocation2]  }
 0x39f   :  { %v2274_v40 = vadd.f32 %v3178_v10, %v3108_v36  ;;  %v2774_v10 = vsel %vm2571_vm4, %v3746_v37, 0  ;;  %s2838_s19 = sshll.u32 %s3778_s18, 4  ;;  %s2839_s19 = int_to_ptr.vmem [resolvable:$true] %s2838_s19 }
 0x3a0   :  { %p3756_p1 = scmp.lt.s32.totalorder %s2839_s19, %s2839_s19 }
 0x3a1   :  { %v2279_v41 = vmax.f32 %v2274_v40, 0.0 }
 0x3a3   :  { %v2297_v43 = vpack.c.bf16 %v2279_v41, %v2279_v41 }
 0x3a5   :  { %3228 = vmatmul.mubr.bf16.vlgmr.msra.gmra.mrb[12].mxu1 %v2297_v43 }
 0x3a6   :  { %3232 = vmatpush3.bf16.msra.mxu1 %v3733_v42  ;;  %3239 = vmatprep.mubr.msk.bf16.mxu1 %vm3777_vm1, %v3776_v17 }
 0x3a7   :  { %3233 = vmatprep.subr.bf16.mxu1 %v3776_v17 }
 0x3aa   :  { %3234 = vmatpush3.bf16.msra.mxu1 %v3734_v44 }
 0x3ab   :  { %3235 = vmatprep.subr.bf16.mxu1 %v3776_v17 }
 0x3ae   :  { %3236 = vmatpush3.bf16.msra.mxu1 %v3735_v45 }
 0x3af   :  { %3237 = vmatprep.subr.bf16.mxu1 %v3776_v17 }
 0x3b2   :  { %3238 = vmatpush3.bf16.msra.mxu1 %v3736_v46 }
 0x3b3   :  { %3243 = vmatprep.subr.bf16.mxu1 %v3776_v17 }
 0x478   :  { %v2386_v48 = vpop.f32.mrb[12].mxu1 }
 0x479   :  { %v2387_v49 = vadd.f32 %v3125_v47, %v2386_v48  ;;  %v3229_v50 = vpop.f32.mrb[13].mxu1 }
 0x47a   :  { %v2389_v51 = vpop.f32.mrb[14].mxu1 }
 0x47b   :  { %v2392_v52 = vmax.f32 %v2387_v49, 0.0  ;;  %v3230_v53 = vpop.f32.mrb[15].mxu1 }
 0x47d   :  { %v2402_v55 = vpack.c.bf16 %v2392_v52, %v2392_v52 }
 0x47f   :  { %3240 = vmatmul.mubr.msk.bf16.vlgmr.msra.gmra.mrb[16].mxu1 %vm2433_vm2, %v2402_v55 }
 0x480   :  { %3244 = vmatpush3.bf16.msra.mxu1 %v3737_v54  ;;  %3247 = vmatprep.mubr.msk.bf16.mxu1 %vm3777_vm1, %v3776_v17 }
 0x481   :  { %3245 = vmatprep.subr.bf16.mxu1 %v3776_v17 }
 0x484   :  { %3246 = vmatpush3.bf16.msra.mxu1 %v3738_v56 }
 0x485   :  { %3251 = vmatprep.subr.bf16.mxu1 %v3776_v17 }
 0x552   :  { %v2471_v58 = vpop.f32.mrb[16].mxu1 }
 0x553   :  { %v2472_v59 = vadd.f32 %v3134_v57, %v2471_v58  ;;  %v3241_v60 = vpop.f32.mrb[17].mxu1 }
 0x554   :  { %v2474_v61 = vpop.f32.mrb[18].mxu1 }
 0x555   :  { %v2477_v62 = vmax.f32 %v2472_v59, 0.0  ;;  %v3242_v63 = vpop.f32.mrb[19].mxu1 }
 0x557   :  { %v2483_v1 = vpack.c.bf16 %v2477_v62, %v2477_v62 }
 0x559   :  { %3248 = vmatmul.mubr.msk.bf16.vlgmr.msra.gmra.mrb[20].mxu1 %vm2502_vm3, %v2483_v1 }
 0x55a   :  { %3252 = vmatpush3.bf16.msra.mxu1 %v3739_v0  ;;  %3255 = vmatprep.mubr.msk.bf16.mxu1 %vm3777_vm1, %v3776_v17 }
 0x55b   :  { %3253 = vmatprep.subr.bf16.mxu1 %v3776_v17 }
 0x55e   :  { %3254 = vmatpush3.bf16.msra.mxu1 %v2573_v4 }
 0x55f   :  { %3259 = vmatprep.subr.bf16.mxu1 %v3776_v17 }
 0x62c   :  { %v2540_v6 = vpop.f32.mrb[20].mxu1 }
 0x62d   :  { %v2541_v7 = vadd.f32 %v3140_v5, %v2540_v6  ;;  %v3249_v8 = vpop.f32.mrb[21].mxu1 }
 0x62e   :  { %v2543_v9 = vpop.f32.mrb[22].mxu1 }
 0x62f   :  { %v2546_v13 = vmax.f32 %v2541_v7, 0.0  ;;  %v3250_v15 = vpop.f32.mrb[23].mxu1 }
 0x631   :  { %v2551_v18 = vpack.c.bf16 %v2546_v13, %v2546_v13 }
 0x633   :  { %3256 = vmatmul.mubr.msk.bf16.vlgmr.msra.gmra.mrb[24].mxu1 %vm2567_vm5, %v2551_v18 }
 0x634   :  { %3260 = vmatpush3.bf16.msra.mxu1 %v3741_v16  ;;  %3263 = vmatprep.mubr.msk.bf16.mxu1 %vm3777_vm1, %v3776_v17 }
 0x635   :  { %3261 = vmatprep.subr.bf16.mxu1 %v3776_v17 }
 0x638   :  { %3262 = vmatpush3.bf16.msra.mxu1 %v2640_v20 }
 0x639   :  { %3267 = vmatprep.subr.bf16.mxu1 %v3776_v17 }
 0x706   :  { %v2609_v22 = vpop.f32.mrb[24].mxu1 }
 0x707   :  { %v2610_v23 = vadd.f32 %v3144_v21, %v2609_v22  ;;  %v3257_v24 = vpop.f32.mrb[25].mxu1 }
 0x708   :  { %v2612_v25 = vpop.f32.mrb[26].mxu1 }
 0x709   :  { %v2615_v26 = vmax.f32 %v2610_v23, 0.0  ;;  %v3258_v27 = vpop.f32.mrb[27].mxu1 }
 0x70b   :  { %v2620_v29 = vpack.c.bf16 %v2615_v26, %v2615_v26 }
 0x70d   :  { %3264 = vmatmul.mubr.msk.bf16.vlgmr.msra.gmra.mrb[28].mxu1 %vm2567_vm5, %v2620_v29 }
 0x70e   :  { %3268 = vmatpush3.bf16.msra.mxu1 %v3743_v28  ;;  %3271 = vmatprep.mubr.msk.bf16.mxu1 %vm3777_vm1, %v3776_v17 }
 0x70f   :  { %3269 = vmatprep.subr.bf16.mxu1 %v3776_v17 }
 0x712   :  { %3270 = vmatpush3.bf16.msra.mxu1 %v2707_v31 }
 0x713   :  { %3275 = vmatprep.subr.bf16.mxu1 %v3776_v17 }
 0x7e0   :  { %v2676_v12 = vpop.f32.mrb[28].mxu1 }
 0x7e1   :  { %v2677_v14 = vadd.f32 %v3148_v11, %v2676_v12  ;;  %v3265_v32 = vpop.f32.mrb[29].mxu1 }
 0x7e2   :  { %v2679_v33 = vpop.f32.mrb[30].mxu1 }
 0x7e3   :  { %v2682_v2 = vmax.f32 %v2677_v14, 0.0  ;;  %v3266_v34 = vpop.f32.mrb[31].mxu1 }
 0x7e5   :  { %v2687_v36 = vpack.c.bf16 %v2682_v2, %v2682_v2 }
 0x7e7   :  { %3272 = vmatmul.mubr.msk.bf16.vlgmr.msra.gmra.mrb[32].mxu1 %vm2567_vm5, %v2687_v36 }
 0x7e8   :  { %3276 = vmatpush3.bf16.msra.mxu1 %v3745_v35  ;;  %3279 = vmatprep.mubr.msk.bf16.mxu1 %vm3777_vm1, %v3776_v17 }
 0x7e9   :  { %3277 = vmatprep.subr.bf16.mxu1 %v3776_v17  ;;  %v3156_v17 = vld [vmem:[%s4947_s20] ss:$0 sm:$0xff]  ;;  %s3751_s20 = scalar_lea.vmem %s2839_s19, 128 }
 0x7ea   :  { %p3752_p0 = scmp.ne.s32.totalorder %s2839_s19, %s3751_s20  ;;  %p3757_p2 = scmp.lt.s32.totalorder %s3751_s20, %s3751_s20 }
 0x7ec   :  { %3278 = vmatpush3.bf16.msra.mxu1 %v2774_v10  ;;  %p3758_p3 = por %p3757_p2, %p3756_p1 }
 0x7ee   :  { %p3759_p4 = pnand %p3758_p3, %p3752_p0 }
 0x8ba   :  { %v2743_v39 = vpop.f32.mrb[32].mxu1 }
 0x8bb   :  { %v2744_v40 = vadd.f32 %v3152_v38, %v2743_v39  ;;  %v3273_v41 = vpop.f32.mrb[33].mxu1 }
 0x8bc   :  { %v2746_v42 = vpop.f32.mrb[34].mxu1 }
 0x8bd   :  { %v2749_v43 = vmax.f32 %v2744_v40, 0.0  ;;  %v3274_v44 = vpop.f32.mrb[35].mxu1 }
 0x8bf   :  { %v2754_v45 = vpack.c.bf16 %v2749_v43, %v2749_v43 }
 0x8c1   :  { %3280 = vmatmul.mubr.msk.bf16.vlgmr.msra.gmra.mrb[36].mxu1 %vm2567_vm5, %v2754_v45 }
 0x994   :  { %v2810_v46 = vpop.f32.mrb[36].mxu1 }
 0x995   :  { %v2811_v47 = vadd.f32 %v3156_v17, %v2810_v46  ;;  %v3281_v48 = vpop.f32.mrb[37].mxu1 }
 0x996   :  { %v2813_v49 = vpop.f32.mrb[38].mxu1 }
 0x997   :  { %v3282_v50 = vpop.f32.mrb[39].mxu1  ;;  %v2817_v51 = vsel %vm2816_vm6, %v2811_v47, -inf }
 0x998   :  { %2818 = vmax.xlane.f32.xlu0 %v2817_v51 }
 0xa25   :  { %v2819_v52 = vpop.xlane.xlu0 %2818 }
 0xa26   :  { %v2820_v53 = vsub.f32 %v2811_v47, %v2819_v52 }
 0xa28   :  { %v2821_v54 = vmul.f32 1.442695, %v2820_v53 }
 0xa2a   :  { %3747 = vpow2.f32 %v2821_v54 }
 0xa34   :  { %v3748_v55 = vpop.eup %3747 }
 0xa35   :  { %v2823_v56 = vsel %vm2816_vm6, %v3748_v55, 0.0 }
 0xa36   :  { %2824 = vadd.xlane.f32.xlu0 %v2823_v56 }
 0xac3   :  { %v2825_v57 = vpop.xlane.xlu0 %2824 }
 0xac4   :  { %3749 = vrcp.f32 %v2825_v57 }
 0xace   :  { %v3750_v58 = vpop.eup %3749 }
 0xacf   :  { %v2827_v59 = vmul.f32 %v3750_v58, %v2825_v57 }
 0xad1   :  { %v2828_v60 = vsub.f32 2.0, %v2827_v59 }
 0xad3   :  { %v2829_v61 = vmul.f32 %v3750_v58, %v2828_v60 }
 0xad5   :  { %v2830_v62 = vmul.f32 %v3748_v55, %v2829_v61 }
 0xad7   :  { %2831 = vst.msk [vmem:[#allocation2] sm:$0xff] %vm2816_vm6, %v2830_v62 }
 0xad8   :  { %3762 = shalt.err (!%p3759_p4)
}
 0xad9   :  { %s3763_s30 = scalar_lea.hbm %s4948_s21, 128 }
 0xada   :  { %p3764_p5 = scmp.ne.s32.totalorder %s4948_s21, %s3763_s30  ;;  %p3767_p6 = scmp.lt.u32.totalorder %s3763_s30, %s4948_s21 }
 0xadc   :  { %p3769_p7 = pnand %p3767_p6, %p3764_p5 }
 0xade   :  { %3772 = shalt.err (!%p3769_p7)
}
 0xadf   :  { %2841 = dma.vmem_to_hbm [thread:$0]  %s2839_s19, 128, %s4948_s21, [#allocation3]  }
 0xae0   :  { %3773 = dma.done.wait [#allocation3], 128  }
 0xae1   :  { %3774 = vsyncadd [#allocation3], 4294967168 }
 0xae2   :  { %2845 = vsyncpa [#allocation3], 1 }

</bundles_post_ra>
